<compile_context>
chip_gen: v7x
topology: tpu7x:2x2x1
jax: 0.10.0
libtpu: 0.0.40
codegen_flags: <defaults>
</compile_context>

<pallas_src>
import functools

import jax
import jax.numpy as jnp
import numpy as np
from jax.experimental import pallas as pl
from jax.experimental.pallas import tpu as pltpu


# ------------------------------ device helpers -------------------------------

def _tpu_generation():
    """Best-effort TPU generation from device_kind (fallback: 6)."""
    try:
        kind = jax.devices()[0].device_kind.lower()
    except Exception:
        return 6
    for g in (7, 6, 5, 4, 3, 2):
        if str(g) in kind:
            return g
    return 6


def _pick_tile_n(total, cap, min_steps):
    """Largest multiple-of-8 divisor of `total` that is <= cap and gives >= min_steps tiles."""
    best = None
    for t in range(8, min(total, cap) + 1, 8):
        if total % t == 0 and total // t >= min_steps:
            best = t
    # Fallback: a single full-extent step (also covers `total` not a multiple of 8).
    # TODO(synk): very large, non-divisible token counts would need padding or a
    # masked tail tile instead of this whole-array fallback.
    return best if best is not None else total


# ----------------------------- Pallas kernel --------------------------------

def _ffn_kernel(x_ref, w1_ref, b1_ref, w2_ref, b2_ref, o_ref, *, bf16_act):
    """Fused Linear -> GELU -> Linear on one (tile_n, dim) slab of tokens."""
    x = x_ref[...]
    if x.dtype != jnp.bfloat16:
        x = x.astype(jnp.bfloat16)          # skipped entirely when the producer feeds bf16

    # Linear 1: bf16 MXU, f32 accumulate.
    h = jnp.dot(x, w1_ref[...], preferred_element_type=jnp.float32)

    # Bias + GELU.  v6e/v7x: bf16 (bf16 VPU/EUP, halves vreg traffic, no extra astype);
    # v5e: f32 (no bf16 VALU/EUP), then one cast for the second MXU pass.
    # TODO(synk): torch nn.GELU defaults to the exact erf form; the tanh approximation
    # (== nn.GELU(approximate='tanh')) is used for robust TPU lowering (EUP tanh),
    # max abs deviation ~3e-3.  Dropout(p=0.0) is the identity and is elided.
    if bf16_act:
        h = h.astype(jnp.bfloat16) + b1_ref[...]           # b1 supplied in bf16
        h = jax.nn.gelu(h, approximate=True)
    else:
        h = h + b1_ref[...]                                # b1 supplied in f32
        h = jax.nn.gelu(h, approximate=True).astype(jnp.bfloat16)

    # Linear 2: bf16 MXU, f32 accumulate, f32 bias add.
    y = jnp.dot(h, w2_ref[...], preferred_element_type=jnp.float32) + b2_ref[...]
    o_ref[...] = y.astype(o_ref.dtype)


# ------------------------------ kernel wrapper --------------------------------

def feedforward_forward(x, params, *, tile_n=None, out_dtype=None):
    """x: (B, N, dim).  Returns (B, N, dim) in out_dtype (default: x.dtype)."""
    B, N, dim = x.shape
    hidden = params["w1"].shape[0]            # torch Linear weight layout: (out, in)
    total = B * N

    # Output dtype follows the input (f32 in -> f32 out, matching the torch module).
    # A bf16 producer/consumer can pass bf16 x / out_dtype=jnp.bfloat16 to halve the
    # streamed HBM bytes of this memory-bound kernel.
    if out_dtype is None:
        out_dtype = x.dtype

    gen = _tpu_generation()
    num_tc = 2 if gen >= 7 else 1              # v7x: 2 TensorCores/chip; v5e/v6e: 1
    bf16_act = gen >= 6                        # v5e has no bf16 VPU/EUP

    # Fewest, largest token tiles (single step on 1-TC chips, >= 2 parallel steps on
    # v7x), capped so double-buffered x/out tiles stay inside the scoped-VMEM default.
    if tile_n is None:
        cap = max(8, min(1024, ((8 << 20) // (16 * dim)) // 8 * 8))
        tile_n = _pick_tile_n(total, cap, num_tc)
    assert total % tile_n == 0, "B*N must be a multiple of tile_n"
    # TODO(synk): non-multiple token counts with an explicit tile_n need a masked tail.
    steps = total // tile_n

    # Flatten (B, N, dim) -> (B*N, dim): contiguous, so this reshape is a free view.
    xs = x.reshape(total, dim)

    # Pre-transpose + pre-cast weights once on the host (bf16 MXU operands).
    w1t = jnp.asarray(params["w1"].T, jnp.bfloat16)            # (dim, hidden)
    w2t = jnp.asarray(params["w2"].T, jnp.bfloat16)            # (hidden, dim)
    b1 = params["b1"].reshape(1, hidden).astype(
        jnp.bfloat16 if bf16_act else jnp.float32)
    b2 = params["b2"].reshape(1, dim).astype(jnp.float32)      # added post-accumulation

    const = lambda i: (0, 0)
    weight_bytes = w1t.size * 2 + w2t.size * 2

    # Constant-index weights/biases are DMA'd once and stay VMEM-resident.  For real
    # transformer dims, double-buffering those resident blocks is pure waste and can
    # blow v7x's 64 MiB VMEM, so single-buffer them (size-triggered so small shapes
    # keep the default pipelining) and set an explicit vmem budget.
    single_buffer_weights = weight_bytes > (8 << 20)

    def wspec(shape):
        if single_buffer_weights:
            return pl.BlockSpec(shape, const, pipeline_mode=pl.Buffered(1))
        return pl.BlockSpec(shape, const)

    if single_buffer_weights:
        act_bytes = 2 * 2 * tile_n * dim * 4        # x + out, double-buffered, f32 worst case
        compiler_params = pltpu.CompilerParams(
            dimension_semantics=("parallel",),
            vmem_limit_bytes=int(weight_bytes + act_bytes
                                 + tile_n * hidden * 4 + (4 << 20)))
    else:
        compiler_params = pltpu.CompilerParams(dimension_semantics=("parallel",))

    out = pl.pallas_call(
        functools.partial(_ffn_kernel, bf16_act=bf16_act),
        out_shape=jax.ShapeDtypeStruct((total, dim), out_dtype),
        grid=(steps,),
        in_specs=[
            pl.BlockSpec((tile_n, dim), lambda i: (i, 0)),     # streamed token tiles
            wspec((dim, hidden)),                              # W1^T (bf16, resident)
            wspec((1, hidden)),                                # b1
            wspec((hidden, dim)),                              # W2^T (bf16, resident)
            wspec((1, dim)),                                   # b2
        ],
        out_specs=pl.BlockSpec((tile_n, dim), lambda i: (i, 0)),
        compiler_params=compiler_params,
    )(xs, w1t, b1, w2t, b2)

    return out.reshape(B, N, dim)


# ----------------------------- parameter setup -------------------------------

def make_params(key, dim, hidden_dim):
    """Deterministic synthetic parameters in PyTorch Linear layout (out, in)."""
    k1, k2, k3, k4 = jax.random.split(key, 4)
    w1 = 0.05 * jax.random.normal(k1, (hidden_dim, dim), jnp.float32)
    b1 = 0.05 * jax.random.normal(k2, (hidden_dim,), jnp.float32)
    w2 = 0.05 * jax.random.normal(k3, (dim, hidden_dim), jnp.float32)
    b2 = 0.05 * jax.random.normal(k4, (dim,), jnp.float32)
    return dict(w1=w1, b1=b1, w2=w2, b2=b2)


# ----------------------------- pure-JAX reference ----------------------------

def ref_forward(x, params):
    h = jnp.einsum("bnd,hd->bnh", x, params["w1"]) + params["b1"]
    h = jax.nn.gelu(h, approximate=True)     # matches kernel (see TODO above)
    y = jnp.einsum("bnh,dh->bnd", h, params["w2"]) + params["b2"]
    return y                                  # Dropout(p=0) = identity


# ----------------------------------- main ------------------------------------

if __name__ == "__main__":
    # Small transformer-ish shapes: batch=2, seq=256 tokens, dim=128, hidden=256.
    # dim is a multiple of 128 -> lane-dense stores; B*N=512 tokens flatten to one
    # step on v5e/v6e and two parallel steps on v7x.
    B, N, DIM, HIDDEN = 2, 256, 128, 256

    key = jax.random.PRNGKey(0)
    kx, kp = jax.random.split(key)
    x = jax.random.normal(kx, (B, N, DIM), jnp.float32)
    params = make_params(kp, DIM, HIDDEN)

    # f32-in / f32-out (matches the torch module's default numerics).
    out = jax.block_until_ready(feedforward_forward(x, params))
    ref = jax.block_until_ready(ref_forward(x, params))
    assert out.shape == (B, N, DIM) and out.dtype == jnp.float32, (out.shape, out.dtype)
    # bf16 MXU operands (and bf16 bias+GELU on v6e/v7x) vs. f32 reference.
    np.testing.assert_allclose(np.asarray(out), np.asarray(ref), rtol=3e-2, atol=3e-2)

    # bf16-in / bf16-out path (what an all-bf16 network would feed/consume): halves
    # streamed HBM bytes; verify it lowers and tracks the f32 reference loosely.
    out_bf16 = jax.block_until_ready(
        feedforward_forward(x.astype(jnp.bfloat16), params, out_dtype=jnp.bfloat16))
    assert out_bf16.shape == (B, N, DIM) and out_bf16.dtype == jnp.bfloat16
    np.testing.assert_allclose(np.asarray(out_bf16.astype(jnp.float32)),
                               np.asarray(ref), rtol=1e-1, atol=1e-1)

    print("KERNEL_OK")
</pallas_src>

<mosaic_0001>
module attributes {stable_mosaic.version = 11 : i64} {
  func.func @_ffn_kernel(%arg0: i32, %arg1: memref<512x128xf32, #tpu.memory_space<vmem>>, %arg2: memref<128x256xbf16, #tpu.memory_space<vmem>>, %arg3: memref<1x256xbf16, #tpu.memory_space<vmem>>, %arg4: memref<256x128xbf16, #tpu.memory_space<vmem>>, %arg5: memref<1x128xf32, #tpu.memory_space<vmem>>, %arg6: memref<512x128xf32, #tpu.memory_space<vmem>>) attributes {dimension_semantics = [#tpu.dimension_semantics<parallel>], iteration_bounds = array<i64: 1>, scalar_prefetch = 0 : i64, scratch_operands = 0 : i64, tpu.core_type = #tpu.core_type<tc>, window_params = [{transform_indices = @transform_0, window_bounds = array<i64: 512, 128>}, {pipeline_mode = #tpu.pipeline_mode<synchronous>, transform_indices = @transform_1, window_bounds = array<i64: 128, 256>}, {pipeline_mode = #tpu.pipeline_mode<synchronous>, transform_indices = @transform_2, window_bounds = array<i64: 1, 256>}, {pipeline_mode = #tpu.pipeline_mode<synchronous>, transform_indices = @transform_3, window_bounds = array<i64: 256, 128>}, {pipeline_mode = #tpu.pipeline_mode<synchronous>, transform_indices = @transform_4, window_bounds = array<i64: 1, 128>}, {transform_indices = @transform_5, window_bounds = array<i64: 512, 128>}]} {
    %c0 = arith.constant 0 : index
    %c0_0 = arith.constant 0 : index
    %0 = vector.load %arg1[%c0, %c0_0] : memref<512x128xf32, #tpu.memory_space<vmem>>, vector<512x128xf32>
    %1 = arith.truncf %0 : vector<512x128xf32> to vector<512x128xbf16>
    %c0_1 = arith.constant 0 : index
    %c0_2 = arith.constant 0 : index
    %2 = vector.load %arg2[%c0_1, %c0_2] : memref<128x256xbf16, #tpu.memory_space<vmem>>, vector<128x256xbf16>
    %cst = arith.constant dense<0.000000e+00> : vector<512x256xf32>
    %3 = tpu.matmul %1, %2, %cst {dimension_numbers = #tpu.dot_dimension_numbers<[1], [0], [0], [1], [0, 0, 1, 1], [], []>} : vector<512x128xbf16>, vector<128x256xbf16>, vector<512x256xf32> -> vector<512x256xf32>
    %4 = arith.truncf %3 : vector<512x256xf32> to vector<512x256xbf16>
    %c0_3 = arith.constant 0 : index
    %c0_4 = arith.constant 0 : index
    %5 = vector.load %arg3[%c0_3, %c0_4] : memref<1x256xbf16, #tpu.memory_space<vmem>>, vector<1x256xbf16>
    %6 = vector.broadcast %5 : vector<1x256xbf16> to vector<512x256xbf16>
    %7 = arith.addf %4, %6 : vector<512x256xbf16>
    %8 = arith.mulf %7, %7 : vector<512x256xbf16>
    %9 = arith.mulf %7, %8 : vector<512x256xbf16>
    %cst_5 = arith.constant 4.467770e-02 : bf16
    %10 = vector.broadcast %cst_5 : bf16 to vector<512x256xbf16>
    %11 = arith.mulf %10, %9 : vector<512x256xbf16>
    %12 = arith.addf %7, %11 : vector<512x256xbf16>
    %cst_6 = arith.constant 7.968750e-01 : bf16
    %13 = vector.broadcast %cst_6 : bf16 to vector<512x256xbf16>
    %14 = arith.mulf %13, %12 : vector<512x256xbf16>
    %15 = math.tanh %14 : vector<512x256xbf16>
    %cst_7 = arith.constant 1.000000e+00 : bf16
    %16 = vector.broadcast %cst_7 : bf16 to vector<512x256xbf16>
    %17 = arith.addf %16, %15 : vector<512x256xbf16>
    %cst_8 = arith.constant 5.000000e-01 : bf16
    %18 = vector.broadcast %cst_8 : bf16 to vector<512x256xbf16>
    %19 = arith.mulf %18, %17 : vector<512x256xbf16>
    %20 = arith.mulf %7, %19 : vector<512x256xbf16>
    %c0_9 = arith.constant 0 : index
    %c0_10 = arith.constant 0 : index
    %21 = vector.load %arg4[%c0_9, %c0_10] : memref<256x128xbf16, #tpu.memory_space<vmem>>, vector<256x128xbf16>
    %cst_11 = arith.constant dense<0.000000e+00> : vector<512x128xf32>
    %22 = tpu.matmul %20, %21, %cst_11 {dimension_numbers = #tpu.dot_dimension_numbers<[1], [0], [0], [1], [0, 0, 1, 1], [], []>} : vector<512x256xbf16>, vector<256x128xbf16>, vector<512x128xf32> -> vector<512x128xf32>
    %c0_12 = arith.constant 0 : index
    %c0_13 = arith.constant 0 : index
    %23 = vector.load %arg5[%c0_12, %c0_13] : memref<1x128xf32, #tpu.memory_space<vmem>>, vector<1x128xf32>
    %24 = vector.broadcast %23 : vector<1x128xf32> to vector<512x128xf32>
    %25 = arith.addf %22, %24 : vector<512x128xf32>
    %c0_14 = arith.constant 0 : index
    %c0_15 = arith.constant 0 : index
    %26 = vector.load %arg6[%c0_14, %c0_15] : memref<512x128xf32, #tpu.memory_space<vmem>>, vector<512x128xf32>
    tpu.vector_store %arg6[%c0_14, %c0_15], %25 {strides = array<i32>} : memref<512x128xf32, #tpu.memory_space<vmem>>, vector<512x128xf32>,
    return
  }
  func.func @transform_0(%arg0: i32) -> (i32, i32) {
    %c0_i32 = arith.constant 0 : i32
    %c0_i32_0 = arith.constant 0 : i32
    return %arg0, %c0_i32 : i32, i32
  }
  func.func @transform_1(%arg0: i32) -> (i32, i32) {
    %c0_i32 = arith.constant 0 : i32
    %c0_i32_0 = arith.constant 0 : i32
    %c0_i32_1 = arith.constant 0 : i32
    return %c0_i32, %c0_i32_0 : i32, i32
  }
  func.func @transform_2(%arg0: i32) -> (i32, i32) {
    %c0_i32 = arith.constant 0 : i32
    %c0_i32_0 = arith.constant 0 : i32
    %c0_i32_1 = arith.constant 0 : i32
    return %c0_i32, %c0_i32_0 : i32, i32
  }
  func.func @transform_3(%arg0: i32) -> (i32, i32) {
    %c0_i32 = arith.constant 0 : i32
    %c0_i32_0 = arith.constant 0 : i32
    %c0_i32_1 = arith.constant 0 : i32
    return %c0_i32, %c0_i32_0 : i32, i32
  }
  func.func @transform_4(%arg0: i32) -> (i32, i32) {
    %c0_i32 = arith.constant 0 : i32
    %c0_i32_0 = arith.constant 0 : i32
    %c0_i32_1 = arith.constant 0 : i32
    return %c0_i32, %c0_i32_0 : i32, i32
  }
  func.func @transform_5(%arg0: i32) -> (i32, i32) {
    %c0_i32 = arith.constant 0 : i32
    %c0_i32_0 = arith.constant 0 : i32
    return %arg0, %c0_i32 : i32, i32
  }
}

</mosaic_0001>

<bundles_post_ra>
// kernel: tpu_custom_call.1
= control target key start
LH: loop header
LB: loop body
LE: loop exit
PB: predicated region body
PF: predicated region fallthrough
CT: control target
= control target key end

     0   :  { %10 = vsyncpa [#allocation3], 0  ;;  %s2954_s0 = inlined_call_operand.hbm [shape: f32[512,128], index: 0, kind: input, shape index: {}]   ;;  %s2955_s1 = inlined_call_operand.hbm [shape: bf16[128,256], index: 1, kind: input, shape index: {}]   ;;  %s2956_s2 = inlined_call_operand.vmem [shape: bf16[1,256], index: 2, kind: input, shape index: {}]   ;;  %s2957_s3 = inlined_call_operand.hbm [shape: bf16[256,128], index: 3, kind: input, shape index: {}]   ;;  %s2958_s4 = inlined_call_operand.vmem [shape: f32[1,128], index: 4, kind: input, shape index: {}]   ;;  %s2959_s5 = inlined_call_operand.hbm [shape: f32[512,128], index: 5, kind: output, shape index: {}]  }
   0x1   :  { %11 = vsyncpa [#allocation6], 0 }
   0x2   :  { %12 = vsyncpa [#allocation4], 0  ;;  %s2198_s18 = smov [#allocation5]   ;;  %s2199_s20 = smov [#allocation2]  }
   0x3   :  { %s30_s19 = sshll.u32 %s2198_s18, 4  ;;  %s18_s21 = sshll.u32 %s2199_s20, 4  ;;  %s31_s19 = int_to_ptr.vmem [resolvable:$true] %s30_s19  ;;  %s2238_s21 = int_to_ptr.vmem [resolvable:$true] %s18_s21 }
   0x4   :  { %s2104_s24 = scalar_lea.hbm %s2955_s1, 2048 }
   0x5   :  { %p2105_p0 = scmp.ne.s32.totalorder %s2955_s1, %s2104_s24  ;;  %p2108_p1 = scmp.lt.u32.totalorder %s2104_s24, %s2955_s1 }
   0x7   :  { %p2110_p2 = pnand %p2108_p1, %p2105_p0 }
   0x9   :  { %2113 = shalt.err (!%p2110_p2)
}
   0xa   :  { %s2114_s29 = scalar_lea.vmem %s31_s19, 2048  ;;  %p2119_p4 = scmp.lt.s32.totalorder %s31_s19, %s31_s19 }
   0xb   :  { %p2115_p3 = scmp.ne.s32.totalorder %s31_s19, %s2114_s29  ;;  %p2120_p5 = scmp.lt.s32.totalorder %s2114_s29, %s2114_s29 }
   0xd   :  { %p2121_p6 = por %p2120_p5, %p2119_p4 }
   0xf   :  { %p2122_p7 = pnand %p2121_p6, %p2115_p3 }
  0x11   :  { %2125 = shalt.err (!%p2122_p7)
}
  0x12   :  { %s2200_s30 = smov 128   ;;  %s2201_s6 = smov 8  }
  0x13   :  { %36 = dma.hbm_to_vmem [thread:$0]  %s2955_s1, 2048, %s31_s19, [#allocation6], %s2200_s30, %s2200_s30, %s2201_s6  }
  0x14   :  { %s2126_s11 = scalar_lea.hbm %s2954_s0, 8192 }
  0x15   :  { %p2127_p8 = scmp.ne.s32.totalorder %s2954_s0, %s2126_s11  ;;  %p2130_p9 = scmp.lt.u32.totalorder %s2126_s11, %s2954_s0 }
  0x17   :  { %p2132_p10 = pnand %p2130_p9, %p2127_p8 }
  0x19   :  { %2135 = shalt.err (!%p2132_p10)
}
  0x1a   :  { %s2136_s16 = scalar_lea.vmem %s2238_s21, 8192  ;;  %p2141_p12 = scmp.lt.s32.totalorder %s2238_s21, %s2238_s21 }
  0x1b   :  { %p2137_p11 = scmp.ne.s32.totalorder %s2238_s21, %s2136_s16  ;;  %p2142_p13 = scmp.lt.s32.totalorder %s2136_s16, %s2136_s16 }
  0x1d   :  { %p2143_p0 = por %p2142_p13, %p2141_p12 }
  0x1f   :  { %p2144_p1 = pnand %p2143_p0, %p2137_p11 }
  0x21   :  { %2147 = shalt.err (!%p2144_p1)
}
  0x22   :  { %24 = dma.hbm_to_vmem [thread:$0]  %s2954_s0, 8192, %s2238_s21, [#allocation3], %s2200_s30, %s2200_s30, %s2201_s6  }
  0x23   :  { %s2202_s18 = smov [#allocation7]   ;;  %s2148_s23 = scalar_lea.hbm %s2957_s3, 2048 }
  0x24   :  { %s44_s19 = sshll.u32 %s2202_s18, 4  ;;  %p2149_p2 = scmp.ne.s32.totalorder %s2957_s3, %s2148_s23  ;;  %s45_s19 = int_to_ptr.vmem [resolvable:$true] %s44_s19 }
  0x25   :  { %p2152_p3 = scmp.lt.u32.totalorder %s2148_s23, %s2957_s3 }
  0x27   :  { %p2154_p4 = pnand %p2152_p3, %p2149_p2 }
  0x29   :  { %2157 = shalt.err (!%p2154_p4)
}
  0x2a   :  { %s2158_s28 = scalar_lea.vmem %s45_s19, 2048  ;;  %p2163_p6 = scmp.lt.s32.totalorder %s45_s19, %s45_s19 }
  0x2b   :  { %p2159_p5 = scmp.ne.s32.totalorder %s45_s19, %s2158_s28  ;;  %p2164_p7 = scmp.lt.s32.totalorder %s2158_s28, %s2158_s28 }
  0x2d   :  { %p2165_p8 = por %p2164_p7, %p2163_p6 }
  0x2f   :  { %p2166_p9 = pnand %p2165_p8, %p2159_p5 }
  0x31   :  { %2169 = shalt.err (!%p2166_p9)
}
  0x32   :  { %s2203_s0 = smov 64   ;;  %s2204_s21 = smov 4  }
  0x33   :  { %50 = dma.hbm_to_vmem [thread:$0]  %s2957_s3, 2048, %s45_s19, [#allocation6], %s2203_s0, %s2203_s0, %s2204_s21  }
  0x34   :  { %2192 = dma.done.wait [#allocation3], 8192  }
  0x35   :  { %2193 = vsyncadd [#allocation3], 4294959104 }
  0x36   :  { %2194 = dma.done.wait [#allocation6], 4096  }
  0x37   :  { %2195 = vsyncadd [#allocation6], 4294963200  ;;  %v2205_v0 = vmov 0   ;;  %v1936_v1 = vld [vmem:[#allocation5 + $0x4] ss:$8 sps:$4 sm:$0xff]   ;;  %v69_v20 = vld [vmem:[#allocation2 + $0x10] sm:$0xff] }
  0x38   :  { %291 = vmatprep.mubr.bf16.mxu0 %v2205_v0  ;;  %1894 = vmatprep.subr.bf16.mxu1 %v2205_v0  ;;  %v1938_v2 = vld [vmem:[#allocation5] ss:$8 sps:$4 sm:$0xff]   ;;  %v1939_v3 = vld [vmem:[#allocation5 + $0x14] ss:$8 sps:$4 sm:$0xff]   ;;  %v1941_v4 = vld [vmem:[#allocation5 + $0x10] ss:$8 sps:$4 sm:$0xff]  }
  0x39   :  { %259 = vmatprep.subr.bf16.mxu0 %v1936_v1  ;;  %v1942_v5 = vld [vmem:[#allocation5 + $0x24] ss:$8 sps:$4 sm:$0xff]   ;;  %v1944_v6 = vld [vmem:[#allocation5 + $0x20] ss:$8 sps:$4 sm:$0xff]   ;;  %v1945_v7 = vld [vmem:[#allocation5 + $0x34] ss:$8 sps:$4 sm:$0xff]  }
  0x3a   :  { %260 = vmatpush1.bf16.msra.mxu0 %v1938_v2  ;;  %v1947_v8 = vld [vmem:[#allocation5 + $0x30] ss:$8 sps:$4 sm:$0xff]   ;;  %v1948_v9 = vld [vmem:[#allocation5 + $0x44] ss:$8 sps:$4 sm:$0xff]   ;;  %v1950_v10 = vld [vmem:[#allocation5 + $0x40] ss:$8 sps:$4 sm:$0xff]  }
  0x3b   :  { %261 = vmatprep.subr.bf16.mxu0 %v1939_v3  ;;  %v1951_v11 = vld [vmem:[#allocation5 + $0x54] ss:$8 sps:$4 sm:$0xff]   ;;  %v1953_v12 = vld [vmem:[#allocation5 + $0x50] ss:$8 sps:$4 sm:$0xff]   ;;  %v1954_v13 = vld [vmem:[#allocation5 + $0x64] ss:$8 sps:$4 sm:$0xff]  }
  0x3c   :  { %v1956_v14 = vld [vmem:[#allocation5 + $0x60] ss:$8 sps:$4 sm:$0xff]   ;;  %v1957_v15 = vld [vmem:[#allocation5 + $0x74] ss:$8 sps:$4 sm:$0xff]   ;;  %v1959_v16 = vld [vmem:[#allocation5 + $0x70] ss:$8 sps:$4 sm:$0xff]  }
  0x3d   :  { %v67_v17 = vld [vmem:[#allocation2] sm:$0xff]  ;;  %v68_v18 = vld [vmem:[#allocation2 + $0x8] sm:$0xff]  ;;  %v70_v21 = vld [vmem:[#allocation2 + $0x18] sm:$0xff] }
  0x3e   :  { %262 = vmatpush1.bf16.msra.mxu0 %v1941_v4  ;;  %v131_v19 = vpack.c.bf16 %v68_v18, %v67_v17  ;;  %v132_v22 = vpack.c.bf16 %v70_v21, %v69_v20  ;;  %v71_v23 = vld [vmem:[#allocation2 + $0x20] sm:$0xff]  ;;  %v72_v24 = vld [vmem:[#allocation2 + $0x28] sm:$0xff]  ;;  %v73_v26 = vld [vmem:[#allocation2 + $0x30] sm:$0xff] }
  0x3f   :  { %263 = vmatprep.subr.bf16.mxu0 %v1942_v5  ;;  %v133_v25 = vpack.c.bf16 %v72_v24, %v71_v23  ;;  %v74_v27 = vld [vmem:[#allocation2 + $0x38] sm:$0xff]  ;;  %v75_v29 = vld [vmem:[#allocation2 + $0x40] sm:$0xff]  ;;  %v76_v30 = vld [vmem:[#allocation2 + $0x48] sm:$0xff] }
  0x40   :  { %v134_v28 = vpack.c.bf16 %v74_v27, %v73_v26  ;;  %v135_v31 = vpack.c.bf16 %v76_v30, %v75_v29  ;;  %v77_v32 = vld [vmem:[#allocation2 + $0x50] sm:$0xff]  ;;  %v78_v33 = vld [vmem:[#allocation2 + $0x58] sm:$0xff]  ;;  %v79_v35 = vld [vmem:[#allocation2 + $0x60] sm:$0xff] }
  0x41   :  { %v136_v34 = vpack.c.bf16 %v78_v33, %v77_v32  ;;  %v80_v36 = vld [vmem:[#allocation2 + $0x68] sm:$0xff]  ;;  %v81_v38 = vld [vmem:[#allocation2 + $0x70] sm:$0xff]  ;;  %v82_v39 = vld [vmem:[#allocation2 + $0x78] sm:$0xff] }
  0x42   :  { %264 = vmatpush1.bf16.msra.mxu0 %v1944_v6  ;;  %v137_v37 = vpack.c.bf16 %v80_v36, %v79_v35  ;;  %v138_v40 = vpack.c.bf16 %v82_v39, %v81_v38  ;;  %v83_v41 = vld [vmem:[#allocation2 + $0x80] sm:$0xff]  ;;  %v84_v42 = vld [vmem:[#allocation2 + $0x88] sm:$0xff]  ;;  %v85_v45 = vld [vmem:[#allocation2 + $0x90] sm:$0xff] }
  0x43   :  { %265 = vmatprep.subr.bf16.mxu0 %v1945_v7  ;;  %v139_v43 = vpack.c.bf16 %v84_v42, %v83_v41  ;;  %v1960_v44 = vld [vmem:[#allocation7] sm:$0xff]   ;;  %v86_v46 = vld [vmem:[#allocation2 + $0x98] sm:$0xff]  ;;  %v1961_v47 = vld [vmem:[#allocation7 + $0x8] sm:$0xff]  }
  0x44   :  { %1910 = vmatpush1.bf16.msra.mxu1 %v1960_v44  ;;  %v140_v48 = vpack.c.bf16 %v86_v46, %v85_v45  ;;  %v1962_v49 = vld [vmem:[#allocation7 + $0x10] sm:$0xff]   ;;  %v87_v50 = vld [vmem:[#allocation2 + $0xa0] sm:$0xff]  ;;  %v88_v51 = vld [vmem:[#allocation2 + $0xa8] sm:$0xff]  ;;  %v2206_v45 = vmov 1966171168  }
  0x45   :  { %1895 = vmatprep.subr.bf16.mxu1 %v2205_v0  ;;  %v1963_v52 = vld [vmem:[#allocation7 + $0x18] sm:$0xff]   ;;  %v141_v53 = vpack.c.bf16 %v88_v51, %v87_v50  ;;  %v1964_v54 = vld [vmem:[#allocation7 + $0x20] sm:$0xff]   ;;  %v89_v55 = vld [vmem:[#allocation2 + $0xb0] sm:$0xff]  ;;  %v687_v46 = vunpack.c.l.s4 %v2206_v45 }
  0x46   :  { %266 = vmatpush1.bf16.msra.mxu0 %v1947_v8  ;;  %v90_v56 = vld [vmem:[#allocation2 + $0xb8] sm:$0xff]  ;;  %v1965_v57 = vld [vmem:[#allocation7 + $0x28] sm:$0xff]   ;;  %v1966_v59 = vld [vmem:[#allocation7 + $0x30] sm:$0xff]  }
  0x47   :  { %267 = vmatprep.subr.bf16.mxu0 %v1948_v9  ;;  %v142_v58 = vpack.c.bf16 %v90_v56, %v89_v55  ;;  %v91_v60 = vld [vmem:[#allocation2 + $0xc0] sm:$0xff]  ;;  %v92_v61 = vld [vmem:[#allocation2 + $0xc8] sm:$0xff]  ;;  %v1967_v62 = vld [vmem:[#allocation7 + $0x38] sm:$0xff]   ;;  %v688_v51 = vunpack.c.0.s8 %v687_v46 }
  0x48   :  { %1911 = vmatpush1.bf16.msra.mxu1 %v1961_v47  ;;  %v143_v63 = vpack.c.bf16 %v92_v61, %v91_v60  ;;  %v1968_v1 = vld [vmem:[#allocation7 + $0x40] sm:$0xff]   ;;  %v93_v2 = vld [vmem:[#allocation2 + $0xd0] sm:$0xff]  ;;  %v94_v3 = vld [vmem:[#allocation2 + $0xd8] sm:$0xff] }
  0x49   :  { %1896 = vmatprep.subr.bf16.mxu1 %v2205_v0  ;;  %v1969_v4 = vld [vmem:[#allocation7 + $0x48] sm:$0xff]   ;;  %v144_v5 = vpack.c.bf16 %v94_v3, %v93_v2  ;;  %v1970_v6 = vld [vmem:[#allocation7 + $0x50] sm:$0xff]   ;;  %v95_v7 = vld [vmem:[#allocation2 + $0xe0] sm:$0xff] }
  0x4a   :  { %268 = vmatpush1.bf16.msra.mxu0 %v1950_v10  ;;  %v96_v8 = vld [vmem:[#allocation2 + $0xe8] sm:$0xff]  ;;  %v1971_v9 = vld [vmem:[#allocation7 + $0x58] sm:$0xff]   ;;  %v99_v17 = vld [vmem:[#allocation2 + $0x100] sm:$0xff] }
  0x4b   :  { %269 = vmatprep.subr.bf16.mxu0 %v1951_v11  ;;  %v145_v10 = vpack.c.bf16 %v96_v8, %v95_v7  ;;  %v1972_v11 = vld [vmem:[#allocation7 + $0x60] sm:$0xff]   ;;  %v100_v18 = vld [vmem:[#allocation2 + $0x108] sm:$0xff]  ;;  %v101_v21 = vld [vmem:[#allocation2 + $0x110] sm:$0xff] }
  0x4c   :  { %1912 = vmatpush1.bf16.msra.mxu1 %v1962_v49  ;;  %v147_v20 = vpack.c.bf16 %v100_v18, %v99_v17  ;;  %v103_v24 = vld [vmem:[#allocation2 + $0x120] sm:$0xff]  ;;  %v105_v27 = vld [vmem:[#allocation2 + $0x130] sm:$0xff]  ;;  %v120_v56 = vld [vmem:[#allocation2 + $0x1a8] sm:$0xff] }
  0x4d   :  { %1897 = vmatprep.subr.bf16.mxu1 %v2205_v0  ;;  %v107_v30 = vld [vmem:[#allocation2 + $0x140] sm:$0xff]  ;;  %v109_v33 = vld [vmem:[#allocation2 + $0x150] sm:$0xff]  ;;  %v122_v2 = vld [vmem:[#allocation2 + $0x1b8] sm:$0xff] }
  0x4e   :  { %270 = vmatpush1.bf16.msra.mxu0 %v1953_v12  ;;  %v97_v12 = vld [vmem:[#allocation2 + $0xf0] sm:$0xff]  ;;  %v111_v36 = vld [vmem:[#allocation2 + $0x160] sm:$0xff] }
  0x4f   :  { %271 = vmatprep.subr.bf16.mxu0 %v1954_v13  ;;  %v98_v13 = vld [vmem:[#allocation2 + $0xf8] sm:$0xff]  ;;  %v113_v39 = vld [vmem:[#allocation2 + $0x170] sm:$0xff]  ;;  %v115_v42 = vld [vmem:[#allocation2 + $0x180] sm:$0xff] }
  0x50   :  { %1913 = vmatpush1.bf16.msra.mxu1 %v1963_v52  ;;  %v119_v55 = vld [vmem:[#allocation2 + $0x1a0] sm:$0xff] }
  0x51   :  { %1898 = vmatprep.subr.bf16.mxu1 %v2205_v0 }
  0x52   :  { %272 = vmatpush1.bf16.msra.mxu0 %v1956_v14  ;;  %v1973_v14 = vld [vmem:[#allocation7 + $0x68] sm:$0xff]  }
  0x53   :  { %273 = vmatprep.subr.bf16.mxu0 %v1957_v15  ;;  %v146_v15 = vpack.c.bf16 %v98_v13, %v97_v12 }
  0x54   :  { %1914 = vmatpush1.bf16.msra.mxu1 %v1964_v54 }
  0x55   :  { %1899 = vmatprep.subr.bf16.mxu1 %v2205_v0 }
  0x56   :  { %274 = vmatpush1.bf16.msra.mxu0 %v1959_v16  ;;  %v1974_v16 = vld [vmem:[#allocation7 + $0x70] sm:$0xff]  }
  0x57   :  { %1489 = vmatprep.subr.bf16.mxu0 %v2205_v0 }
  0x58   :  { %1915 = vmatpush1.bf16.msra.mxu1 %v1965_v57 }
  0x59   :  { %292 = vmatmul.mubr.bf16.vlgmr.msra.gmra.mrb[0].mxu0 %v131_v19  ;;  %1900 = vmatprep.subr.bf16.mxu1 %v2205_v0  ;;  %v1975_v19 = vld [vmem:[#allocation7 + $0x78] sm:$0xff]  }
  0x5a   :  { %301 = vmatprep.mubr.bf16.mxu0 %v2205_v0  ;;  %1490 = vmatpush1.bf16.msra.mxu0 %v1960_v44 }
  0x5b   :  { %1491 = vmatprep.subr.bf16.mxu0 %v2205_v0 }
  0x5c   :  { %1916 = vmatpush1.bf16.msra.mxu1 %v1966_v59 }
  0x5d   :  { %1901 = vmatprep.subr.bf16.mxu1 %v2205_v0 }
  0x5e   :  { %1492 = vmatpush1.bf16.msra.mxu0 %v1961_v47  ;;  %v689_v47 = vlaneseq }
  0x5f   :  { %1493 = vmatprep.subr.bf16.mxu0 %v2205_v0 }
  0x60   :  { %1917 = vmatpush1.bf16.msra.mxu1 %v1967_v62 }
  0x61   :  { %302 = vmatmul.mubr.bf16.gmra.mrb[4].mxu0 %v132_v22  ;;  %1902 = vmatprep.subr.bf16.mxu1 %v2205_v0  ;;  %v102_v22 = vld [vmem:[#allocation2 + $0x118] sm:$0xff] }
  0x62   :  { %311 = vmatprep.mubr.bf16.mxu0 %v2205_v0  ;;  %1494 = vmatpush1.bf16.msra.mxu0 %v1962_v49  ;;  %v148_v23 = vpack.c.bf16 %v102_v22, %v101_v21  ;;  %v118_v49 = vld [vmem:[#allocation2 + $0x198] sm:$0xff] }
  0x63   :  { %1495 = vmatprep.subr.bf16.mxu0 %v2205_v0 }
  0x64   :  { %1918 = vmatpush1.bf16.msra.mxu1 %v1968_v1 }
  0x65   :  { %1903 = vmatprep.subr.bf16.mxu1 %v2205_v0 }
  0x66   :  { %1496 = vmatpush1.bf16.msra.mxu0 %v1963_v52  ;;  %v690_v52 = vshrl.u32 %v689_v47, 7 }
  0x67   :  { %1497 = vmatprep.subr.bf16.mxu0 %v2205_v0 }
  0x68   :  { %1919 = vmatpush1.bf16.msra.mxu1 %v1969_v4 }
  0x69   :  { %312 = vmatmul.mubr.bf16.gmra.mrb[8].mxu0 %v133_v25  ;;  %1904 = vmatprep.subr.bf16.mxu1 %v2205_v0  ;;  %v104_v25 = vld [vmem:[#allocation2 + $0x128] sm:$0xff] }
  0x6a   :  { %321 = vmatprep.mubr.bf16.mxu0 %v2205_v0  ;;  %1498 = vmatpush1.bf16.msra.mxu0 %v1964_v54  ;;  %v149_v26 = vpack.c.bf16 %v104_v25, %v103_v24  ;;  %v691_v54 = vsub.s32 %v688_v51, %v690_v52 }
  0x6b   :  { %1499 = vmatprep.subr.bf16.mxu0 %v2205_v0 }
  0x6c   :  { %1920 = vmatpush1.bf16.msra.mxu1 %v1970_v6 }
  0x6d   :  { %1905 = vmatprep.subr.bf16.mxu1 %v2205_v0 }
  0x6e   :  { %1500 = vmatpush1.bf16.msra.mxu0 %v1965_v57 }
  0x6f   :  { %1501 = vmatprep.subr.bf16.mxu0 %v2205_v0 }
  0x70   :  { %1921 = vmatpush1.bf16.msra.mxu1 %v1971_v9 }
  0x71   :  { %322 = vmatmul.mubr.bf16.gmra.mrb[12].mxu0 %v134_v28  ;;  %1906 = vmatprep.subr.bf16.mxu1 %v2205_v0  ;;  %v106_v28 = vld [vmem:[#allocation2 + $0x138] sm:$0xff] }
  0x72   :  { %331 = vmatprep.mubr.bf16.mxu0 %v2205_v0  ;;  %1502 = vmatpush1.bf16.msra.mxu0 %v1966_v59  ;;  %v150_v29 = vpack.c.bf16 %v106_v28, %v105_v27 }
  0x73   :  { %1503 = vmatprep.subr.bf16.mxu0 %v2205_v0 }
  0x74   :  { %1922 = vmatpush1.bf16.msra.mxu1 %v1972_v11 }
  0x75   :  { %1907 = vmatprep.subr.bf16.mxu1 %v2205_v0 }
  0x76   :  { %1504 = vmatpush1.bf16.msra.mxu0 %v1967_v62  ;;  %v705_v62 = vsub.s32 0, %v690_v52 }
  0x77   :  { %1505 = vmatprep.subr.bf16.mxu0 %v2205_v0 }
  0x78   :  { %1923 = vmatpush1.bf16.msra.mxu1 %v1973_v14 }
  0x79   :  { %332 = vmatmul.mubr.bf16.gmra.mrb[16].mxu0 %v135_v31  ;;  %1908 = vmatprep.subr.bf16.mxu1 %v2205_v0  ;;  %v108_v31 = vld [vmem:[#allocation2 + $0x148] sm:$0xff] }
  0x7a   :  { %341 = vmatprep.mubr.bf16.mxu0 %v2205_v0  ;;  %1506 = vmatpush1.bf16.msra.mxu0 %v1968_v1  ;;  %v151_v32 = vpack.c.bf16 %v108_v31, %v107_v30  ;;  %v121_v1 = vld [vmem:[#allocation2 + $0x1b0] sm:$0xff] }
  0x7b   :  { %1507 = vmatprep.subr.bf16.mxu0 %v2205_v0 }
  0x7c   :  { %1924 = vmatpush1.bf16.msra.mxu1 %v1974_v16 }
  0x7d   :  { %1909 = vmatprep.subr.bf16.mxu1 %v2205_v0 }
  0x7e   :  { %1508 = vmatpush1.bf16.msra.mxu0 %v1969_v4 }
  0x7f   :  { %1509 = vmatprep.subr.bf16.mxu0 %v2205_v0 }
  0x80   :  { %1925 = vmatpush1.bf16.msra.mxu1 %v1975_v19 }
  0x81   :  { %342 = vmatmul.mubr.bf16.gmra.mrb[20].mxu0 %v136_v34  ;;  %v110_v34 = vld [vmem:[#allocation2 + $0x158] sm:$0xff] }
  0x82   :  { %351 = vmatprep.mubr.bf16.mxu0 %v2205_v0  ;;  %1510 = vmatpush1.bf16.msra.mxu0 %v1970_v6  ;;  %v152_v35 = vpack.c.bf16 %v110_v34, %v109_v33  ;;  %v158_v6 = vpack.c.bf16 %v122_v2, %v121_v1  ;;  %v126_v33 = vld [vmem:[#allocation2 + $0x1d8] sm:$0xff] }
  0x83   :  { %1511 = vmatprep.subr.bf16.mxu0 %v2205_v0 }
  0x86   :  { %1512 = vmatpush1.bf16.msra.mxu0 %v1971_v9 }
  0x87   :  { %1513 = vmatprep.subr.bf16.mxu0 %v2205_v0 }
  0x89   :  { %352 = vmatmul.mubr.bf16.gmra.mrb[24].mxu0 %v137_v37  ;;  %v112_v37 = vld [vmem:[#allocation2 + $0x168] sm:$0xff] }
  0x8a   :  { %361 = vmatprep.mubr.bf16.mxu0 %v2205_v0  ;;  %1514 = vmatpush1.bf16.msra.mxu0 %v1972_v11  ;;  %v153_v38 = vpack.c.bf16 %v112_v37, %v111_v36 }
  0x8b   :  { %1515 = vmatprep.subr.bf16.mxu0 %v2205_v0 }
  0x8e   :  { %1516 = vmatpush1.bf16.msra.mxu0 %v1973_v14  ;;  %v123_v14 = vld [vmem:[#allocation2 + $0x1c0] sm:$0xff] }
  0x8f   :  { %1517 = vmatprep.subr.bf16.mxu0 %v2205_v0 }
  0x91   :  { %362 = vmatmul.mubr.bf16.gmra.mrb[28].mxu0 %v138_v40  ;;  %v114_v40 = vld [vmem:[#allocation2 + $0x178] sm:$0xff] }
  0x92   :  { %371 = vmatprep.mubr.bf16.mxu0 %v2205_v0  ;;  %1518 = vmatpush1.bf16.msra.mxu0 %v1974_v16  ;;  %v154_v41 = vpack.c.bf16 %v114_v40, %v113_v39 }
  0x93   :  { %1519 = vmatprep.subr.bf16.mxu0 %v2205_v0 }
  0x96   :  { %1520 = vmatpush1.bf16.msra.mxu0 %v1975_v19 }
  0x99   :  { %372 = vmatmul.mubr.bf16.gmra.mrb[32].mxu0 %v139_v43  ;;  %v116_v43 = vld [vmem:[#allocation2 + $0x188] sm:$0xff] }
  0x9a   :  { %381 = vmatprep.mubr.bf16.mxu0 %v2205_v0  ;;  %v155_v44 = vpack.c.bf16 %v116_v43, %v115_v42 }
  0xa1   :  { %382 = vmatmul.mubr.bf16.gmra.mrb[36].mxu0 %v140_v48  ;;  %v117_v48 = vld [vmem:[#allocation2 + $0x190] sm:$0xff] }
  0xa2   :  { %391 = vmatprep.mubr.bf16.mxu0 %v2205_v0  ;;  %v156_v50 = vpack.c.bf16 %v118_v49, %v117_v48 }
  0xa9   :  { %392 = vmatmul.mubr.bf16.gmra.mrb[40].mxu0 %v141_v53  ;;  %v1876_v53 = vld.sshfl [vmem:[%s2956_s2] sm:$0x11 pattern:$0x75316420] }
  0xaa   :  { %401 = vmatprep.mubr.bf16.mxu0 %v2205_v0  ;;  %v685_v57 = vcombine.high %v1876_v53, %v1876_v53  ;;  %v692_v59 = vrot.slane %v1876_v53, %v691_v54  ;;  %v127_v53 = vld [vmem:[#allocation2 + $0x1e0] sm:$0xff] }
  0xac   :  { %v699_v60 = vrot.slane %v685_v57, %v691_v54  ;;  %v701_v61 = vpack.i.b16 %v692_v59, %v692_v59  ;;  %v128_v54 = vld [vmem:[#allocation2 + $0x1e8] sm:$0xff] }
  0xb1   :  { %402 = vmatmul.mubr.bf16.gmra.mrb[44].mxu0 %v142_v58  ;;  %v157_v58 = vpack.c.bf16 %v120_v56, %v119_v55 }
  0xb2   :  { %411 = vmatprep.mubr.bf16.mxu0 %v2205_v0 }
  0xb9   :  { %412 = vmatmul.mubr.bf16.gmra.mrb[48].mxu0 %v143_v63  ;;  %v708_v63 = vpack.i.b16 %v699_v60, %v699_v60 }
  0xba   :  { %421 = vmatprep.mubr.bf16.mxu0 %v2205_v0 }
  0xbb   :  { %v2352_v8 = vrot.slane %v708_v63, %v705_v62 }
  0xc1   :  { %422 = vmatmul.mubr.bf16.gmra.mrb[52].mxu0 %v144_v5  ;;  %v2350_v5 = vrot.slane %v701_v61, %v705_v62  ;;  %v161_v62 = vpack.c.bf16 %v128_v54, %v127_v53 }
  0xc2   :  { %431 = vmatprep.mubr.bf16.mxu0 %v2205_v0 }
  0xc9   :  { %432 = vmatmul.mubr.bf16.gmra.mrb[56].mxu0 %v145_v10 }
  0xca   :  { %441 = vmatprep.mubr.bf16.mxu0 %v2205_v0 }
  0xd1   :  { %442 = vmatmul.mubr.bf16.gmra.mrb[60].mxu0 %v146_v15  ;;  %v124_v15 = vld [vmem:[#allocation2 + $0x1c8] sm:$0xff] }
  0xd2   :  { %451 = vmatprep.mubr.bf16.mxu0 %v2205_v0  ;;  %v159_v21 = vpack.c.bf16 %v124_v15, %v123_v14 }
  0xd9   :  { %452 = vmatmul.mubr.bf16.gmra.mrb[64].mxu0 %v147_v20 }
  0xda   :  { %461 = vmatprep.mubr.bf16.mxu0 %v2205_v0 }
  0xe1   :  { %462 = vmatmul.mubr.bf16.gmra.mrb[68].mxu0 %v148_v23 }
  0xe2   :  { %471 = vmatprep.mubr.bf16.mxu0 %v2205_v0 }
  0xe9   :  { %472 = vmatmul.mubr.bf16.gmra.mrb[72].mxu0 %v149_v26 }
  0xea   :  { %481 = vmatprep.mubr.bf16.mxu0 %v2205_v0 }
  0xf1   :  { %482 = vmatmul.mubr.bf16.gmra.mrb[76].mxu0 %v150_v29 }
  0xf2   :  { %491 = vmatprep.mubr.bf16.mxu0 %v2205_v0 }
  0xf9   :  { %492 = vmatmul.mubr.bf16.gmra.mrb[80].mxu0 %v151_v32  ;;  %v125_v32 = vld [vmem:[#allocation2 + $0x1d0] sm:$0xff] }
  0xfa   :  { %501 = vmatprep.mubr.bf16.mxu0 %v2205_v0  ;;  %v160_v42 = vpack.c.bf16 %v126_v33, %v125_v32 }
 0x101   :  { %502 = vmatmul.mubr.bf16.gmra.mrb[84].mxu0 %v152_v35 }
 0x102   :  { %511 = vmatprep.mubr.bf16.mxu0 %v2205_v0 }
 0x109   :  { %512 = vmatmul.mubr.bf16.gmra.mrb[88].mxu0 %v153_v38 }
 0x10a   :  { %521 = vmatprep.mubr.bf16.mxu0 %v2205_v0 }
 0x111   :  { %522 = vmatmul.mubr.bf16.gmra.mrb[92].mxu0 %v154_v41 }
 0x112   :  { %531 = vmatprep.mubr.bf16.mxu0 %v2205_v0 }
 0x119   :  { %532 = vmatmul.mubr.bf16.gmra.mrb[96].mxu0 %v155_v44 }
 0x11a   :  { %541 = vmatprep.mubr.bf16.mxu0 %v2205_v0 }
 0x121   :  { %542 = vmatmul.mubr.bf16.gmra.mrb[100].mxu0 %v156_v50 }
 0x122   :  { %551 = vmatprep.mubr.bf16.mxu0 %v2205_v0 }
 0x129   :  { %552 = vmatmul.mubr.bf16.gmra.mrb[104].mxu0 %v157_v58 }
 0x12a   :  { %561 = vmatprep.mubr.bf16.mxu0 %v2205_v0 }
 0x12c   :  { %v293_v3 = vpop.f32.mrb[0].mxu0 }
 0x12d   :  { %v295_v4 = vpop.f32.mrb[1].mxu0 }
 0x12e   :  { %v297_v7 = vpop.f32.mrb[2].mxu0 }
 0x12f   :  { %v612_v9 = vpack.c.bf16 %v297_v7, %v293_v3  ;;  %v299_v10 = vpop.f32.mrb[3].mxu0 }
 0x130   :  { %v613_v11 = vpack.c.bf16 %v299_v10, %v295_v4 }
 0x131   :  { %v2355_v12 = vadd.bf16 %v2350_v5, %v612_v9  ;;  %562 = vmatmul.mubr.bf16.gmra.mrb[108].mxu0 %v158_v6 }
 0x132   :  { %v2358_v13 = vadd.bf16 %v2352_v8, %v613_v11  ;;  %571 = vmatprep.mubr.bf16.mxu0 %v2205_v0 }
 0x133   :  { %v778_v16 = vmul.bf16 %v2355_v12, %v2355_v12 }
 0x134   :  { %v779_v17 = vmul.bf16 %v2358_v13, %v2358_v13  ;;  %v303_v18 = vpop.f32.mrb[4].mxu0 }
 0x135   :  { %v842_v19 = vmul.bf16 %v778_v16, %v2355_v12  ;;  %v305_v20 = vpop.f32.mrb[5].mxu0  ;;  %v129_v16 = vld [vmem:[#allocation2 + $0x1f0] sm:$0xff] }
 0x136   :  { %v843_v22 = vmul.bf16 %v779_v17, %v2358_v13  ;;  %v307_v23 = vpop.f32.mrb[6].mxu0  ;;  %v130_v17 = vld [vmem:[#allocation2 + $0x1f8] sm:$0xff] }
 0x137   :  { %v906_v24 = vmul.bf16 1027030327, %v842_v19  ;;  %v614_v25 = vpack.c.bf16 %v307_v23, %v303_v18  ;;  %v309_v26 = vpop.f32.mrb[7].mxu0 }
 0x138   :  { %v907_v27 = vmul.bf16 1027030327, %v843_v22  ;;  %v615_v28 = vpack.c.bf16 %v309_v26, %v305_v20 }
 0x139   :  { %v970_v29 = vadd.bf16 %v906_v24, %v2355_v12  ;;  %v2369_v30 = vadd.bf16 %v2350_v5, %v614_v25  ;;  %572 = vmatmul.mubr.bf16.gmra.mrb[112].mxu0 %v159_v21 }
 0x13a   :  { %v2372_v31 = vadd.bf16 %v2352_v8, %v615_v28  ;;  %581 = vmatprep.mubr.bf16.mxu0 %v2205_v0  ;;  %v971_v34 = vadd.bf16 %v907_v27, %v2358_v13 }
 0x13b   :  { %v780_v35 = vmul.bf16 %v2369_v30, %v2369_v30  ;;  %v1034_v39 = vmul.bf16 1061961548, %v970_v29 }
 0x13c   :  { %v781_v36 = vmul.bf16 %v2372_v31, %v2372_v31  ;;  %v313_v37 = vpop.f32.mrb[8].mxu0  ;;  %v1035_v38 = vmul.bf16 1061961548, %v971_v34 }
 0x13d   :  { %v844_v40 = vmul.bf16 %v780_v35, %v2369_v30  ;;  %v315_v41 = vpop.f32.mrb[9].mxu0 }
 0x13e   :  { %v845_v43 = vmul.bf16 %v781_v36, %v2372_v31  ;;  %v317_v44 = vpop.f32.mrb[10].mxu0  ;;  %1976 = vtanh.bf16 %v1035_v38 }
 0x13f   :  { %v908_v45 = vmul.bf16 1027030327, %v844_v40  ;;  %v616_v46 = vpack.c.bf16 %v317_v44, %v313_v37  ;;  %v319_v47 = vpop.f32.mrb[11].mxu0  ;;  %1978 = vtanh.bf16 %v1034_v39 }
 0x140   :  { %v909_v48 = vmul.bf16 1027030327, %v845_v43  ;;  %v617_v49 = vpack.c.bf16 %v319_v47, %v315_v41 }
 0x141   :  { %v2383_v50 = vadd.bf16 %v2350_v5, %v616_v46  ;;  %582 = vmatmul.mubr.bf16.gmra.mrb[116].mxu0 %v160_v42  ;;  %v972_v51 = vadd.bf16 %v908_v45, %v2369_v30 }
 0x142   :  { %v2387_v52 = vadd.bf16 %v2352_v8, %v617_v49  ;;  %591 = vmatprep.mubr.bf16.mxu0 %v2205_v0  ;;  %v973_v55 = vadd.bf16 %v909_v48, %v2372_v31 }
 0x143   :  { %v782_v56 = vmul.bf16 %v2383_v50, %v2383_v50  ;;  %v1036_v63 = vmul.bf16 1061961548, %v972_v51 }
 0x144   :  { %v783_v57 = vmul.bf16 %v2387_v52, %v2387_v52  ;;  %v323_v58 = vpop.f32.mrb[12].mxu0  ;;  %v1037_v59 = vmul.bf16 1061961548, %v973_v55 }
 0x145   :  { %v846_v60 = vmul.bf16 %v782_v56, %v2383_v50  ;;  %v325_v61 = vpop.f32.mrb[13].mxu0 }
 0x146   :  { %v327_v1 = vpop.f32.mrb[14].mxu0  ;;  %1980 = vtanh.bf16 %v1037_v59  ;;  %v847_v2 = vmul.bf16 %v783_v57, %v2387_v52 }
 0x147   :  { %v910_v3 = vmul.bf16 1027030327, %v846_v60  ;;  %v618_v4 = vpack.c.bf16 %v327_v1, %v323_v58  ;;  %v329_v6 = vpop.f32.mrb[15].mxu0  ;;  %1982 = vtanh.bf16 %v1036_v63 }
 0x148   :  { %v619_v7 = vpack.c.bf16 %v329_v6, %v325_v61  ;;  %v911_v9 = vmul.bf16 1027030327, %v847_v2 }
 0x149   :  { %v1977_v10 = vpop.eup %1976  ;;  %v2398_v11 = vadd.bf16 %v2350_v5, %v618_v4  ;;  %592 = vmatmul.mubr.bf16.gmra.mrb[120].mxu0 %v161_v62  ;;  %v974_v14 = vadd.bf16 %v910_v3, %v2383_v50 }
 0x14a   :  { %v2402_v15 = vadd.bf16 %v2352_v8, %v619_v7  ;;  %601 = vmatprep.mubr.bf16.mxu0 %v2205_v0  ;;  %v1163_v18 = vadd.bf16 1065369472, %v1977_v10  ;;  %v975_v19 = vadd.bf16 %v911_v9, %v2387_v52  ;;  %v1979_v22 = vpop.eup %1978  ;;  %v162_v0 = vpack.c.bf16 %v130_v17, %v129_v16 }
 0x14b   :  { %v784_v20 = vmul.bf16 %v2398_v11, %v2398_v11  ;;  %v1038_v21 = vmul.bf16 1061961548, %v974_v14  ;;  %v1162_v33 = vadd.bf16 1065369472, %v1979_v22 }
 0x14c   :  { %v785_v23 = vmul.bf16 %v2402_v15, %v2402_v15  ;;  %v333_v24 = vpop.f32.mrb[16].mxu0  ;;  %v1227_v25 = vmul.bf16 1056980736, %v1163_v18  ;;  %v1039_v26 = vmul.bf16 1061961548, %v975_v19 }
 0x14d   :  { %v848_v27 = vmul.bf16 %v784_v20, %v2398_v11  ;;  %v335_v28 = vpop.f32.mrb[17].mxu0  ;;  %1984 = vtanh.bf16 %v1038_v21  ;;  %v1226_v46 = vmul.bf16 1056980736, %v1162_v33 }
 0x14e   :  { %v849_v29 = vmul.bf16 %v785_v23, %v2402_v15  ;;  %v337_v32 = vpop.f32.mrb[18].mxu0  ;;  %1986 = vtanh.bf16 %v1039_v26  ;;  %v1291_v39 = vmul.bf16 %v1227_v25, %v2358_v13 }
 0x14f   :  { %v912_v34 = vmul.bf16 1027030327, %v848_v27  ;;  %v620_v35 = vpack.c.bf16 %v337_v32, %v333_v24  ;;  %v339_v36 = vpop.f32.mrb[19].mxu0  ;;  %v1290_v59 = vmul.bf16 %v1226_v46, %v2355_v12 }
 0x150   :  { %v913_v37 = vmul.bf16 1027030327, %v849_v29  ;;  %v621_v38 = vpack.c.bf16 %v339_v36, %v335_v28 }
 0x151   :  { %v1981_v40 = vpop.eup %1980  ;;  %v2414_v41 = vadd.bf16 %v2350_v5, %v620_v35  ;;  %602 = vmatmul.mubr.bf16.gmra.mrb[124].mxu0 %v162_v0  ;;  %v976_v42 = vadd.bf16 %v912_v34, %v2398_v11 }
 0x152   :  { %v2418_v43 = vadd.bf16 %v2352_v8, %v621_v38  ;;  %1521 = vmatprep.mubr.bf16.mxu0 %v1291_v39  ;;  %v1165_v44 = vadd.bf16 1065369472, %v1981_v40  ;;  %v977_v45 = vadd.bf16 %v913_v37, %v2402_v15  ;;  %v1983_v13 = vpop.eup %1982 }
 0x153   :  { %v786_v47 = vmul.bf16 %v2414_v41, %v2414_v41  ;;  %v1040_v48 = vmul.bf16 1061961548, %v976_v42  ;;  %v1164_v63 = vadd.bf16 1065369472, %v1983_v13 }
 0x154   :  { %v787_v49 = vmul.bf16 %v2418_v43, %v2418_v43  ;;  %v343_v51 = vpop.f32.mrb[20].mxu0  ;;  %v1229_v53 = vmul.bf16 1056980736, %v1165_v44  ;;  %v1041_v54 = vmul.bf16 1061961548, %v977_v45 }
 0x155   :  { %v850_v55 = vmul.bf16 %v786_v47, %v2414_v41  ;;  %v345_v56 = vpop.f32.mrb[21].mxu0  ;;  %1988 = vtanh.bf16 %v1040_v48  ;;  %v1228_v18 = vmul.bf16 1056980736, %v1164_v63 }
 0x156   :  { %v851_v57 = vmul.bf16 %v787_v49, %v2418_v43  ;;  %v347_v58 = vpop.f32.mrb[22].mxu0  ;;  %1990 = vtanh.bf16 %v1041_v54  ;;  %v1293_v4 = vmul.bf16 %v1229_v53, %v2372_v31 }
 0x157   :  { %v914_v60 = vmul.bf16 1027030327, %v850_v55  ;;  %v622_v61 = vpack.c.bf16 %v347_v58, %v343_v51  ;;  %v349_v62 = vpop.f32.mrb[23].mxu0  ;;  %v1292_v33 = vmul.bf16 %v1228_v18, %v2369_v30 }
 0x158   :  { %v1985_v1 = vpop.eup %1984  ;;  %v915_v2 = vmul.bf16 1027030327, %v851_v57  ;;  %v623_v3 = vpack.c.bf16 %v349_v62, %v345_v56 }
 0x159   :  { %v1987_v6 = vpop.eup %1986  ;;  %v2430_v7 = vadd.bf16 %v2350_v5, %v622_v61  ;;  %1522 = vmatmul.mubr.bf16.vlgmr.msra.gmra.mrb[128].mxu0 %v1290_v59  ;;  %v1166_v9 = vadd.bf16 1065369472, %v1985_v1  ;;  %v978_v10 = vadd.bf16 %v914_v60, %v2414_v41 }
 0x15a   :  { %v2434_v14 = vadd.bf16 %v2352_v8, %v623_v3  ;;  %1529 = vmatprep.mubr.bf16.mxu0 %v1293_v4  ;;  %v1167_v12 = vadd.bf16 1065369472, %v1987_v6  ;;  %v979_v16 = vadd.bf16 %v915_v2, %v2418_v43 }
 0x15b   :  { %v788_v17 = vmul.bf16 %v2430_v7, %v2430_v7  ;;  %v1230_v31 = vmul.bf16 1056980736, %v1166_v9  ;;  %v1042_v19 = vmul.bf16 1061961548, %v978_v10 }
 0x15c   :  { %v789_v20 = vmul.bf16 %v2434_v14, %v2434_v14  ;;  %v353_v21 = vpop.f32.mrb[24].mxu0  ;;  %v1231_v22 = vmul.bf16 1056980736, %v1167_v12  ;;  %v1043_v23 = vmul.bf16 1061961548, %v979_v16 }
 0x15d   :  { %v852_v24 = vmul.bf16 %v788_v17, %v2430_v7  ;;  %v355_v25 = vpop.f32.mrb[25].mxu0  ;;  %1992 = vtanh.bf16 %v1042_v19  ;;  %v1294_v34 = vmul.bf16 %v1230_v31, %v2383_v50 }
 0x15e   :  { %v853_v26 = vmul.bf16 %v789_v20, %v2434_v14  ;;  %v357_v27 = vpop.f32.mrb[26].mxu0  ;;  %v1295_v28 = vmul.bf16 %v1231_v22, %v2387_v52  ;;  %1994 = vtanh.bf16 %v1043_v23 }
 0x15f   :  { %v916_v0 = vmul.bf16 1027030327, %v852_v24  ;;  %v624_v29 = vpack.c.bf16 %v357_v27, %v353_v21  ;;  %v359_v32 = vpop.f32.mrb[27].mxu0 }
 0x160   :  { %v1989_v35 = vpop.eup %1988  ;;  %v917_v36 = vmul.bf16 1027030327, %v853_v26  ;;  %v625_v37 = vpack.c.bf16 %v359_v32, %v355_v25  ;;  %1537 = vmatprep.mubr.bf16.mxu1 %v1295_v28 }
 0x161   :  { %v1991_v38 = vpop.eup %1990  ;;  %v2447_v39 = vadd.bf16 %v2350_v5, %v624_v29  ;;  %1530 = vmatmul.mubr.bf16.gmra.mrb[132].mxu0 %v1292_v33  ;;  %1538 = vmatmul.mubr.bf16.vlgmr.msra.gmra.mrb[0].mxu1 %v1294_v34  ;;  %v1168_v40 = vadd.bf16 1065369472, %v1989_v35  ;;  %v980_v52 = vadd.bf16 %v916_v0, %v2430_v7 }
 0x162   :  { %v2451_v42 = vadd.bf16 %v2352_v8, %v625_v37  ;;  %v1169_v44 = vadd.bf16 1065369472, %v1991_v38  ;;  %v981_v30 = vadd.bf16 %v917_v36, %v2434_v14 }
 0x163   :  { %v790_v50 = vmul.bf16 %v2447_v39, %v2447_v39  ;;  %v1232_v45 = vmul.bf16 1056980736, %v1168_v40  ;;  %v1044_v46 = vmul.bf16 1061961548, %v980_v52 }
 0x164   :  { %v791_v47 = vmul.bf16 %v2451_v42, %v2451_v42  ;;  %v363_v48 = vpop.f32.mrb[28].mxu0  ;;  %v1233_v13 = vmul.bf16 1056980736, %v1169_v44  ;;  %v1045_v49 = vmul.bf16 1061961548, %v981_v30 }
 0x165   :  { %v854_v51 = vmul.bf16 %v790_v50, %v2447_v39  ;;  %v365_v53 = vpop.f32.mrb[29].mxu0  ;;  %1996 = vtanh.bf16 %v1044_v46  ;;  %v1296_v60 = vmul.bf16 %v1232_v45, %v2398_v11 }
 0x166   :  { %v855_v54 = vmul.bf16 %v791_v47, %v2451_v42  ;;  %v367_v55 = vpop.f32.mrb[30].mxu0  ;;  %v1297_v56 = vmul.bf16 %v1233_v13, %v2402_v15  ;;  %1998 = vtanh.bf16 %v1045_v49 }
 0x167   :  { %v918_v57 = vmul.bf16 1027030327, %v854_v51  ;;  %v626_v58 = vpack.c.bf16 %v367_v55, %v363_v48  ;;  %v369_v59 = vpop.f32.mrb[31].mxu0 }
 0x168   :  { %v1993_v61 = vpop.eup %1992  ;;  %v919_v62 = vmul.bf16 1027030327, %v855_v54  ;;  %v627_v63 = vpack.c.bf16 %v369_v59, %v365_v53  ;;  %1545 = vmatprep.mubr.bf16.mxu1 %v1297_v56 }
 0x169   :  { %v1995_v1 = vpop.eup %1994  ;;  %v2463_v2 = vadd.bf16 %v2350_v5, %v626_v58  ;;  %1546 = vmatmul.mubr.bf16.gmra.mrb[4].mxu1 %v1296_v60  ;;  %v1170_v3 = vadd.bf16 1065369472, %v1993_v61  ;;  %v982_v4 = vadd.bf16 %v918_v57, %v2447_v39 }
 0x16a   :  { %v2467_v15 = vadd.bf16 %v2352_v8, %v627_v63  ;;  %v1171_v6 = vadd.bf16 1065369472, %v1995_v1  ;;  %v983_v9 = vadd.bf16 %v919_v62, %v2451_v42 }
 0x16b   :  { %v792_v11 = vmul.bf16 %v2463_v2, %v2463_v2  ;;  %v1234_v10 = vmul.bf16 1056980736, %v1170_v3  ;;  %v1046_v12 = vmul.bf16 1061961548, %v982_v4 }
 0x16c   :  { %v793_v16 = vmul.bf16 %v2467_v15, %v2467_v15  ;;  %v373_v17 = vpop.f32.mrb[32].mxu0  ;;  %v1235_v18 = vmul.bf16 1056980736, %v1171_v6  ;;  %v1047_v31 = vmul.bf16 1061961548, %v983_v9 }
 0x16d   :  { %v856_v19 = vmul.bf16 %v792_v11, %v2463_v2  ;;  %v375_v20 = vpop.f32.mrb[33].mxu0  ;;  %2000 = vtanh.bf16 %v1046_v12  ;;  %v1298_v27 = vmul.bf16 %v1234_v10, %v2414_v41 }
 0x16e   :  { %v857_v21 = vmul.bf16 %v793_v16, %v2467_v15  ;;  %v377_v22 = vpop.f32.mrb[34].mxu0  ;;  %v1299_v23 = vmul.bf16 %v1235_v18, %v2418_v43  ;;  %2002 = vtanh.bf16 %v1047_v31 }
 0x16f   :  { %v920_v24 = vmul.bf16 1027030327, %v856_v19  ;;  %v628_v25 = vpack.c.bf16 %v377_v22, %v373_v17  ;;  %v379_v26 = vpop.f32.mrb[35].mxu0 }
 0x170   :  { %v1997_v28 = vpop.eup %1996  ;;  %v921_v0 = vmul.bf16 1027030327, %v857_v21  ;;  %v629_v29 = vpack.c.bf16 %v379_v26, %v375_v20  ;;  %1553 = vmatprep.mubr.bf16.mxu1 %v1299_v23 }
 0x171   :  { %v1999_v32 = vpop.eup %1998  ;;  %v2479_v33 = vadd.bf16 %v2350_v5, %v628_v25  ;;  %1554 = vmatmul.mubr.bf16.gmra.mrb[8].mxu1 %v1298_v27  ;;  %v1172_v34 = vadd.bf16 1065369472, %v1997_v28  ;;  %v984_v35 = vadd.bf16 %v920_v24, %v2463_v2 }
 0x172   :  { %v2483_v43 = vadd.bf16 %v2352_v8, %v629_v29  ;;  %v1173_v36 = vadd.bf16 1065369472, %v1999_v32  ;;  %v985_v37 = vadd.bf16 %v921_v0, %v2467_v15 }
 0x173   :  { %v794_v41 = vmul.bf16 %v2479_v33, %v2479_v33  ;;  %v1236_v38 = vmul.bf16 1056980736, %v1172_v34  ;;  %v1048_v40 = vmul.bf16 1061961548, %v984_v35 }
 0x174   :  { %v795_v52 = vmul.bf16 %v2483_v43, %v2483_v43  ;;  %v383_v44 = vpop.f32.mrb[36].mxu0  ;;  %v1237_v30 = vmul.bf16 1056980736, %v1173_v36  ;;  %v1049_v50 = vmul.bf16 1061961548, %v985_v37 }
 0x175   :  { %v858_v45 = vmul.bf16 %v794_v41, %v2479_v33  ;;  %v385_v46 = vpop.f32.mrb[37].mxu0  ;;  %2004 = vtanh.bf16 %v1048_v40  ;;  %v1300_v54 = vmul.bf16 %v1236_v38, %v2430_v7 }
 0x176   :  { %v859_v47 = vmul.bf16 %v795_v52, %v2483_v43  ;;  %v387_v48 = vpop.f32.mrb[38].mxu0  ;;  %v1301_v13 = vmul.bf16 %v1237_v30, %v2434_v14  ;;  %2006 = vtanh.bf16 %v1049_v50 }
 0x177   :  { %v922_v49 = vmul.bf16 1027030327, %v858_v45  ;;  %v630_v51 = vpack.c.bf16 %v387_v48, %v383_v44  ;;  %v389_v53 = vpop.f32.mrb[39].mxu0 }
 0x178   :  { %v2001_v55 = vpop.eup %2000  ;;  %v923_v56 = vmul.bf16 1027030327, %v859_v47  ;;  %v631_v57 = vpack.c.bf16 %v389_v53, %v385_v46  ;;  %1561 = vmatprep.mubr.bf16.mxu1 %v1301_v13 }
 0x179   :  { %v2003_v58 = vpop.eup %2002  ;;  %v2495_v59 = vadd.bf16 %v2350_v5, %v630_v51  ;;  %1562 = vmatmul.mubr.bf16.gmra.mrb[12].mxu1 %v1300_v54  ;;  %v1174_v60 = vadd.bf16 1065369472, %v2001_v55  ;;  %v986_v61 = vadd.bf16 %v922_v49, %v2479_v33 }
 0x17a   :  { %v2499_v14 = vadd.bf16 %v2352_v8, %v631_v57  ;;  %v1175_v62 = vadd.bf16 1065369472, %v2003_v58  ;;  %v987_v63 = vadd.bf16 %v923_v56, %v2483_v43 }
 0x17b   :  { %v796_v7 = vmul.bf16 %v2495_v59, %v2495_v59  ;;  %v1238_v1 = vmul.bf16 1056980736, %v1174_v60  ;;  %v1050_v3 = vmul.bf16 1061961548, %v986_v61 }
 0x17c   :  { %v797_v4 = vmul.bf16 %v2499_v14, %v2499_v14  ;;  %v393_v6 = vpop.f32.mrb[40].mxu0  ;;  %v1239_v9 = vmul.bf16 1056980736, %v1175_v62  ;;  %v1051_v11 = vmul.bf16 1061961548, %v987_v63 }
 0x17d   :  { %v860_v10 = vmul.bf16 %v796_v7, %v2495_v59  ;;  %v395_v12 = vpop.f32.mrb[41].mxu0  ;;  %2008 = vtanh.bf16 %v1050_v3  ;;  %v1302_v21 = vmul.bf16 %v1238_v1, %v2447_v39 }
 0x17e   :  { %v861_v16 = vmul.bf16 %v797_v4, %v2499_v14  ;;  %v397_v17 = vpop.f32.mrb[42].mxu0  ;;  %v1303_v18 = vmul.bf16 %v1239_v9, %v2451_v42  ;;  %2010 = vtanh.bf16 %v1051_v11 }
 0x17f   :  { %v924_v31 = vmul.bf16 1027030327, %v860_v10  ;;  %v632_v19 = vpack.c.bf16 %v397_v17, %v393_v6  ;;  %v399_v20 = vpop.f32.mrb[43].mxu0 }
 0x180   :  { %v2005_v22 = vpop.eup %2004  ;;  %v925_v23 = vmul.bf16 1027030327, %v861_v16  ;;  %v633_v24 = vpack.c.bf16 %v399_v20, %v395_v12  ;;  %1569 = vmatprep.mubr.bf16.mxu1 %v1303_v18 }
 0x181   :  { %v2007_v25 = vpop.eup %2006  ;;  %v2511_v26 = vadd.bf16 %v2350_v5, %v632_v19  ;;  %1570 = vmatmul.mubr.bf16.gmra.mrb[16].mxu1 %v1302_v21  ;;  %v1176_v27 = vadd.bf16 1065369472, %v2005_v22  ;;  %v988_v28 = vadd.bf16 %v924_v31, %v2495_v59 }
 0x182   :  { %v2515_v42 = vadd.bf16 %v2352_v8, %v633_v24  ;;  %v1177_v0 = vadd.bf16 1065369472, %v2007_v25  ;;  %v989_v29 = vadd.bf16 %v925_v23, %v2499_v14 }
 0x183   :  { %v798_v39 = vmul.bf16 %v2511_v26, %v2511_v26  ;;  %v1240_v32 = vmul.bf16 1056980736, %v1176_v27  ;;  %v1052_v34 = vmul.bf16 1061961548, %v988_v28 }
 0x184   :  { %v799_v35 = vmul.bf16 %v2515_v42, %v2515_v42  ;;  %v403_v36 = vpop.f32.mrb[44].mxu0  ;;  %v1241_v37 = vmul.bf16 1056980736, %v1177_v0  ;;  %v1053_v41 = vmul.bf16 1061961548, %v989_v29 }
 0x185   :  { %v862_v38 = vmul.bf16 %v798_v39, %v2511_v26  ;;  %v405_v40 = vpop.f32.mrb[45].mxu0  ;;  %2012 = vtanh.bf16 %v1052_v34  ;;  %v1304_v47 = vmul.bf16 %v1240_v32, %v2463_v2 }
 0x186   :  { %v863_v52 = vmul.bf16 %v799_v35, %v2515_v42  ;;  %v407_v44 = vpop.f32.mrb[46].mxu0  ;;  %v1305_v30 = vmul.bf16 %v1241_v37, %v2467_v15  ;;  %2014 = vtanh.bf16 %v1053_v41 }
 0x187   :  { %v926_v50 = vmul.bf16 1027030327, %v862_v38  ;;  %v634_v45 = vpack.c.bf16 %v407_v44, %v403_v36  ;;  %v409_v46 = vpop.f32.mrb[47].mxu0 }
 0x188   :  { %v2009_v48 = vpop.eup %2008  ;;  %v927_v13 = vmul.bf16 1027030327, %v863_v52  ;;  %v635_v49 = vpack.c.bf16 %v409_v46, %v405_v40  ;;  %1577 = vmatprep.mubr.bf16.mxu1 %v1305_v30 }
 0x189   :  { %v2011_v51 = vpop.eup %2010  ;;  %v2527_v53 = vadd.bf16 %v2350_v5, %v634_v45  ;;  %1578 = vmatmul.mubr.bf16.gmra.mrb[20].mxu1 %v1304_v47  ;;  %v1178_v54 = vadd.bf16 1065369472, %v2009_v48  ;;  %v990_v55 = vadd.bf16 %v926_v50, %v2511_v26 }
 0x18a   :  { %v2531_v15 = vadd.bf16 %v2352_v8, %v635_v49  ;;  %v1179_v56 = vadd.bf16 1065369472, %v2011_v51  ;;  %v991_v57 = vadd.bf16 %v927_v13, %v2515_v42 }
 0x18b   :  { %v800_v2 = vmul.bf16 %v2527_v53, %v2527_v53  ;;  %v1242_v58 = vmul.bf16 1056980736, %v1178_v54  ;;  %v1054_v60 = vmul.bf16 1061961548, %v990_v55 }
 0x18c   :  { %v801_v61 = vmul.bf16 %v2531_v15, %v2531_v15  ;;  %v413_v62 = vpop.f32.mrb[48].mxu0  ;;  %v1243_v63 = vmul.bf16 1056980736, %v1179_v56  ;;  %v1055_v7 = vmul.bf16 1061961548, %v991_v57 }
 0x18d   :  { %v864_v1 = vmul.bf16 %v800_v2, %v2527_v53  ;;  %v415_v3 = vpop.f32.mrb[49].mxu0  ;;  %2016 = vtanh.bf16 %v1054_v60  ;;  %v1306_v16 = vmul.bf16 %v1242_v58, %v2479_v33 }
 0x18e   :  { %v865_v4 = vmul.bf16 %v801_v61, %v2531_v15  ;;  %v417_v6 = vpop.f32.mrb[50].mxu0  ;;  %v1307_v9 = vmul.bf16 %v1243_v63, %v2483_v43  ;;  %2018 = vtanh.bf16 %v1055_v7 }
 0x18f   :  { %v928_v11 = vmul.bf16 1027030327, %v864_v1  ;;  %v636_v10 = vpack.c.bf16 %v417_v6, %v413_v62  ;;  %v419_v12 = vpop.f32.mrb[51].mxu0 }
 0x190   :  { %v2013_v17 = vpop.eup %2012  ;;  %v929_v18 = vmul.bf16 1027030327, %v865_v4  ;;  %v637_v31 = vpack.c.bf16 %v419_v12, %v415_v3  ;;  %1585 = vmatprep.mubr.bf16.mxu1 %v1307_v9 }
 0x191   :  { %v2015_v19 = vpop.eup %2014  ;;  %v2543_v20 = vadd.bf16 %v2350_v5, %v636_v10  ;;  %1586 = vmatmul.mubr.bf16.gmra.mrb[24].mxu1 %v1306_v16  ;;  %v1180_v21 = vadd.bf16 1065369472, %v2013_v17  ;;  %v992_v22 = vadd.bf16 %v928_v11, %v2527_v53 }
 0x192   :  { %v2547_v43 = vadd.bf16 %v2352_v8, %v637_v31  ;;  %v1181_v23 = vadd.bf16 1065369472, %v2015_v19  ;;  %v993_v24 = vadd.bf16 %v929_v18, %v2531_v15 }
 0x193   :  { %v802_v33 = vmul.bf16 %v2543_v20, %v2543_v20  ;;  %v1244_v25 = vmul.bf16 1056980736, %v1180_v21  ;;  %v1056_v27 = vmul.bf16 1061961548, %v992_v22 }
 0x194   :  { %v803_v28 = vmul.bf16 %v2547_v43, %v2547_v43  ;;  %v423_v0 = vpop.f32.mrb[52].mxu0  ;;  %v1245_v29 = vmul.bf16 1056980736, %v1181_v23  ;;  %v1057_v39 = vmul.bf16 1061961548, %v993_v24 }
 0x195   :  { %v866_v32 = vmul.bf16 %v802_v33, %v2543_v20  ;;  %v425_v34 = vpop.f32.mrb[53].mxu0  ;;  %2020 = vtanh.bf16 %v1056_v27  ;;  %v1308_v52 = vmul.bf16 %v1244_v25, %v2495_v59 }
 0x196   :  { %v867_v35 = vmul.bf16 %v803_v28, %v2547_v43  ;;  %v427_v36 = vpop.f32.mrb[54].mxu0  ;;  %v1309_v37 = vmul.bf16 %v1245_v29, %v2499_v14  ;;  %2022 = vtanh.bf16 %v1057_v39 }
 0x197   :  { %v930_v41 = vmul.bf16 1027030327, %v866_v32  ;;  %v638_v38 = vpack.c.bf16 %v427_v36, %v423_v0  ;;  %v429_v40 = vpop.f32.mrb[55].mxu0 }
 0x198   :  { %v2017_v44 = vpop.eup %2016  ;;  %v931_v30 = vmul.bf16 1027030327, %v867_v35  ;;  %v639_v50 = vpack.c.bf16 %v429_v40, %v425_v34  ;;  %1593 = vmatprep.mubr.bf16.mxu1 %v1309_v37 }
 0x199   :  { %v2019_v45 = vpop.eup %2018  ;;  %v2559_v46 = vadd.bf16 %v2350_v5, %v638_v38  ;;  %1594 = vmatmul.mubr.bf16.gmra.mrb[28].mxu1 %v1308_v52  ;;  %v1182_v47 = vadd.bf16 1065369472, %v2017_v44  ;;  %v994_v48 = vadd.bf16 %v930_v41, %v2543_v20 }
 0x19a   :  { %v2563_v14 = vadd.bf16 %v2352_v8, %v639_v50  ;;  %v1183_v13 = vadd.bf16 1065369472, %v2019_v45  ;;  %v995_v49 = vadd.bf16 %v931_v30, %v2547_v43 }
 0x19b   :  { %v804_v59 = vmul.bf16 %v2559_v46, %v2559_v46  ;;  %v1246_v51 = vmul.bf16 1056980736, %v1182_v47  ;;  %v1058_v54 = vmul.bf16 1061961548, %v994_v48 }
 0x19c   :  { %v805_v55 = vmul.bf16 %v2563_v14, %v2563_v14  ;;  %v433_v56 = vpop.f32.mrb[56].mxu0  ;;  %v1247_v57 = vmul.bf16 1056980736, %v1183_v13  ;;  %v1059_v2 = vmul.bf16 1061961548, %v995_v49 }
 0x19d   :  { %v868_v58 = vmul.bf16 %v804_v59, %v2559_v46  ;;  %v435_v60 = vpop.f32.mrb[57].mxu0  ;;  %2024 = vtanh.bf16 %v1058_v54  ;;  %v1310_v4 = vmul.bf16 %v1246_v51, %v2511_v26 }
 0x19e   :  { %v869_v61 = vmul.bf16 %v805_v55, %v2563_v14  ;;  %v437_v62 = vpop.f32.mrb[58].mxu0  ;;  %v1311_v63 = vmul.bf16 %v1247_v57, %v2515_v42  ;;  %2026 = vtanh.bf16 %v1059_v2 }
 0x19f   :  { %v932_v7 = vmul.bf16 1027030327, %v868_v58  ;;  %v640_v1 = vpack.c.bf16 %v437_v62, %v433_v56  ;;  %v439_v3 = vpop.f32.mrb[59].mxu0 }
 0x1a0   :  { %v2021_v6 = vpop.eup %2020  ;;  %v933_v9 = vmul.bf16 1027030327, %v869_v61  ;;  %v641_v11 = vpack.c.bf16 %v439_v3, %v435_v60  ;;  %1601 = vmatprep.mubr.bf16.mxu1 %v1311_v63 }
 0x1a1   :  { %v2023_v10 = vpop.eup %2022  ;;  %v2575_v12 = vadd.bf16 %v2350_v5, %v640_v1  ;;  %1602 = vmatmul.mubr.bf16.gmra.mrb[32].mxu1 %v1310_v4  ;;  %v1184_v16 = vadd.bf16 1065369472, %v2021_v6  ;;  %v996_v17 = vadd.bf16 %v932_v7, %v2559_v46 }
 0x1a2   :  { %v2579_v42 = vadd.bf16 %v2352_v8, %v641_v11  ;;  %v1185_v18 = vadd.bf16 1065369472, %v2023_v10  ;;  %v997_v31 = vadd.bf16 %v933_v9, %v2563_v14 }
 0x1a3   :  { %v806_v26 = vmul.bf16 %v2575_v12, %v2575_v12  ;;  %v1248_v19 = vmul.bf16 1056980736, %v1184_v16  ;;  %v1060_v21 = vmul.bf16 1061961548, %v996_v17 }
 0x1a4   :  { %v807_v22 = vmul.bf16 %v2579_v42, %v2579_v42  ;;  %v443_v23 = vpop.f32.mrb[60].mxu0  ;;  %v1249_v24 = vmul.bf16 1056980736, %v1185_v18  ;;  %v1061_v33 = vmul.bf16 1061961548, %v997_v31 }
 0x1a5   :  { %v870_v25 = vmul.bf16 %v806_v26, %v2575_v12  ;;  %v445_v27 = vpop.f32.mrb[61].mxu0  ;;  %2028 = vtanh.bf16 %v1060_v21  ;;  %v1312_v35 = vmul.bf16 %v1248_v19, %v2527_v53 }
 0x1a6   :  { %v871_v28 = vmul.bf16 %v807_v22, %v2579_v42  ;;  %v447_v0 = vpop.f32.mrb[62].mxu0  ;;  %v1313_v29 = vmul.bf16 %v1249_v24, %v2531_v15  ;;  %2030 = vtanh.bf16 %v1061_v33 }
 0x1a7   :  { %v934_v39 = vmul.bf16 1027030327, %v870_v25  ;;  %v642_v32 = vpack.c.bf16 %v447_v0, %v443_v23  ;;  %v449_v34 = vpop.f32.mrb[63].mxu0 }
 0x1a8   :  { %v2025_v36 = vpop.eup %2024  ;;  %v935_v37 = vmul.bf16 1027030327, %v871_v28  ;;  %v643_v41 = vpack.c.bf16 %v449_v34, %v445_v27  ;;  %1609 = vmatprep.mubr.bf16.mxu1 %v1313_v29 }
 0x1a9   :  { %v2027_v38 = vpop.eup %2026  ;;  %v2591_v40 = vadd.bf16 %v2350_v5, %v642_v32  ;;  %1610 = vmatmul.mubr.bf16.gmra.mrb[36].mxu1 %v1312_v35  ;;  %v1186_v52 = vadd.bf16 1065369472, %v2025_v36  ;;  %v998_v44 = vadd.bf16 %v934_v39, %v2575_v12 }
 0x1aa   :  { %v2595_v15 = vadd.bf16 %v2352_v8, %v643_v41  ;;  %v1187_v30 = vadd.bf16 1065369472, %v2027_v38  ;;  %v999_v50 = vadd.bf16 %v935_v37, %v2579_v42 }
 0x1ab   :  { %v808_v53 = vmul.bf16 %v2591_v40, %v2591_v40  ;;  %v1250_v45 = vmul.bf16 1056980736, %v1186_v52  ;;  %v1062_v47 = vmul.bf16 1061961548, %v998_v44 }
 0x1ac   :  { %v809_v48 = vmul.bf16 %v2595_v15, %v2595_v15  ;;  %v453_v13 = vpop.f32.mrb[64].mxu0  ;;  %v1251_v49 = vmul.bf16 1056980736, %v1187_v30  ;;  %v1063_v59 = vmul.bf16 1061961548, %v999_v50 }
 0x1ad   :  { %v872_v51 = vmul.bf16 %v808_v53, %v2591_v40  ;;  %v455_v54 = vpop.f32.mrb[65].mxu0  ;;  %2032 = vtanh.bf16 %v1062_v47  ;;  %v1314_v61 = vmul.bf16 %v1250_v45, %v2543_v20 }
 0x1ae   :  { %v873_v55 = vmul.bf16 %v809_v48, %v2595_v15  ;;  %v457_v56 = vpop.f32.mrb[66].mxu0  ;;  %v1315_v57 = vmul.bf16 %v1251_v49, %v2547_v43  ;;  %2034 = vtanh.bf16 %v1063_v59 }
 0x1af   :  { %v936_v2 = vmul.bf16 1027030327, %v872_v51  ;;  %v644_v58 = vpack.c.bf16 %v457_v56, %v453_v13  ;;  %v459_v60 = vpop.f32.mrb[67].mxu0 }
 0x1b0   :  { %v2029_v62 = vpop.eup %2028  ;;  %v937_v63 = vmul.bf16 1027030327, %v873_v55  ;;  %v645_v7 = vpack.c.bf16 %v459_v60, %v455_v54  ;;  %1617 = vmatprep.mubr.bf16.mxu1 %v1315_v57 }
 0x1b1   :  { %v2031_v1 = vpop.eup %2030  ;;  %v2607_v3 = vadd.bf16 %v2350_v5, %v644_v58  ;;  %1618 = vmatmul.mubr.bf16.gmra.mrb[40].mxu1 %v1314_v61  ;;  %v1188_v4 = vadd.bf16 1065369472, %v2029_v62  ;;  %v1000_v6 = vadd.bf16 %v936_v2, %v2591_v40 }
 0x1b2   :  { %v2611_v43 = vadd.bf16 %v2352_v8, %v645_v7  ;;  %v1189_v9 = vadd.bf16 1065369472, %v2031_v1  ;;  %v1001_v11 = vadd.bf16 %v937_v63, %v2595_v15 }
 0x1b3   :  { %v810_v20 = vmul.bf16 %v2607_v3, %v2607_v3  ;;  %v1252_v10 = vmul.bf16 1056980736, %v1188_v4  ;;  %v1064_v16 = vmul.bf16 1061961548, %v1000_v6 }
 0x1b4   :  { %v811_v17 = vmul.bf16 %v2611_v43, %v2611_v43  ;;  %v463_v18 = vpop.f32.mrb[68].mxu0  ;;  %v1253_v31 = vmul.bf16 1056980736, %v1189_v9  ;;  %v1065_v26 = vmul.bf16 1061961548, %v1001_v11 }
 0x1b5   :  { %v874_v19 = vmul.bf16 %v810_v20, %v2607_v3  ;;  %v465_v21 = vpop.f32.mrb[69].mxu0  ;;  %2036 = vtanh.bf16 %v1064_v16  ;;  %v1316_v28 = vmul.bf16 %v1252_v10, %v2559_v46 }
 0x1b6   :  { %v875_v22 = vmul.bf16 %v811_v17, %v2611_v43  ;;  %v467_v23 = vpop.f32.mrb[70].mxu0  ;;  %v1317_v24 = vmul.bf16 %v1253_v31, %v2563_v14  ;;  %2038 = vtanh.bf16 %v1065_v26 }
 0x1b7   :  { %v938_v33 = vmul.bf16 1027030327, %v874_v19  ;;  %v646_v25 = vpack.c.bf16 %v467_v23, %v463_v18  ;;  %v469_v27 = vpop.f32.mrb[71].mxu0 }
 0x1b8   :  { %v2033_v0 = vpop.eup %2032  ;;  %v939_v29 = vmul.bf16 1027030327, %v875_v22  ;;  %v647_v39 = vpack.c.bf16 %v469_v27, %v465_v21  ;;  %1625 = vmatprep.mubr.bf16.mxu1 %v1317_v24 }
 0x1b9   :  { %v2035_v32 = vpop.eup %2034  ;;  %v2623_v34 = vadd.bf16 %v2350_v5, %v646_v25  ;;  %1626 = vmatmul.mubr.bf16.gmra.mrb[44].mxu1 %v1316_v28  ;;  %v1190_v35 = vadd.bf16 1065369472, %v2033_v0  ;;  %v1002_v36 = vadd.bf16 %v938_v33, %v2607_v3 }
 0x1ba   :  { %v2627_v14 = vadd.bf16 %v2352_v8, %v647_v39  ;;  %v1191_v37 = vadd.bf16 1065369472, %v2035_v32  ;;  %v1003_v41 = vadd.bf16 %v939_v29, %v2611_v43 }
 0x1bb   :  { %v812_v46 = vmul.bf16 %v2623_v34, %v2623_v34  ;;  %v1254_v38 = vmul.bf16 1056980736, %v1190_v35  ;;  %v1066_v52 = vmul.bf16 1061961548, %v1002_v36 }
 0x1bc   :  { %v813_v44 = vmul.bf16 %v2627_v14, %v2627_v14  ;;  %v473_v30 = vpop.f32.mrb[72].mxu0  ;;  %v1255_v50 = vmul.bf16 1056980736, %v1191_v37  ;;  %v1067_v53 = vmul.bf16 1061961548, %v1003_v41 }
 0x1bd   :  { %v876_v45 = vmul.bf16 %v812_v46, %v2623_v34  ;;  %v475_v47 = vpop.f32.mrb[73].mxu0  ;;  %2040 = vtanh.bf16 %v1066_v52  ;;  %v1318_v55 = vmul.bf16 %v1254_v38, %v2575_v12 }
 0x1be   :  { %v877_v48 = vmul.bf16 %v813_v44, %v2627_v14  ;;  %v477_v13 = vpop.f32.mrb[74].mxu0  ;;  %v1319_v49 = vmul.bf16 %v1255_v50, %v2579_v42  ;;  %2042 = vtanh.bf16 %v1067_v53 }
 0x1bf   :  { %v940_v59 = vmul.bf16 1027030327, %v876_v45  ;;  %v648_v51 = vpack.c.bf16 %v477_v13, %v473_v30  ;;  %v479_v54 = vpop.f32.mrb[75].mxu0 }
 0x1c0   :  { %v2037_v56 = vpop.eup %2036  ;;  %v941_v57 = vmul.bf16 1027030327, %v877_v48  ;;  %v649_v2 = vpack.c.bf16 %v479_v54, %v475_v47  ;;  %1633 = vmatprep.mubr.bf16.mxu1 %v1319_v49 }
 0x1c1   :  { %v2039_v58 = vpop.eup %2038  ;;  %v2639_v60 = vadd.bf16 %v2350_v5, %v648_v51  ;;  %1634 = vmatmul.mubr.bf16.gmra.mrb[48].mxu1 %v1318_v55  ;;  %v1192_v61 = vadd.bf16 1065369472, %v2037_v56  ;;  %v1004_v62 = vadd.bf16 %v940_v59, %v2623_v34 }
 0x1c2   :  { %v2643_v42 = vadd.bf16 %v2352_v8, %v649_v2  ;;  %v1193_v63 = vadd.bf16 1065369472, %v2039_v58  ;;  %v1005_v7 = vadd.bf16 %v941_v57, %v2627_v14 }
 0x1c3   :  { %v814_v12 = vmul.bf16 %v2639_v60, %v2639_v60  ;;  %v1256_v1 = vmul.bf16 1056980736, %v1192_v61  ;;  %v1068_v4 = vmul.bf16 1061961548, %v1004_v62 }
 0x1c4   :  { %v815_v6 = vmul.bf16 %v2643_v42, %v2643_v42  ;;  %v483_v9 = vpop.f32.mrb[76].mxu0  ;;  %v1257_v11 = vmul.bf16 1056980736, %v1193_v63  ;;  %v1069_v20 = vmul.bf16 1061961548, %v1005_v7 }
 0x1c5   :  { %v878_v10 = vmul.bf16 %v814_v12, %v2639_v60  ;;  %v485_v16 = vpop.f32.mrb[77].mxu0  ;;  %2044 = vtanh.bf16 %v1068_v4  ;;  %v1320_v22 = vmul.bf16 %v1256_v1, %v2591_v40 }
 0x1c6   :  { %v879_v17 = vmul.bf16 %v815_v6, %v2643_v42  ;;  %v487_v18 = vpop.f32.mrb[78].mxu0  ;;  %v1321_v31 = vmul.bf16 %v1257_v11, %v2595_v15  ;;  %2046 = vtanh.bf16 %v1069_v20 }
 0x1c7   :  { %v942_v26 = vmul.bf16 1027030327, %v878_v10  ;;  %v650_v19 = vpack.c.bf16 %v487_v18, %v483_v9  ;;  %v489_v21 = vpop.f32.mrb[79].mxu0 }
 0x1c8   :  { %v2041_v23 = vpop.eup %2040  ;;  %v943_v24 = vmul.bf16 1027030327, %v879_v17  ;;  %v651_v33 = vpack.c.bf16 %v489_v21, %v485_v16  ;;  %1641 = vmatprep.mubr.bf16.mxu1 %v1321_v31 }
 0x1c9   :  { %v2043_v25 = vpop.eup %2042  ;;  %v2655_v27 = vadd.bf16 %v2350_v5, %v650_v19  ;;  %1642 = vmatmul.mubr.bf16.gmra.mrb[52].mxu1 %v1320_v22  ;;  %v1194_v28 = vadd.bf16 1065369472, %v2041_v23  ;;  %v1006_v0 = vadd.bf16 %v942_v26, %v2639_v60 }
 0x1ca   :  { %v2659_v15 = vadd.bf16 %v2352_v8, %v651_v33  ;;  %v1195_v29 = vadd.bf16 1065369472, %v2043_v25  ;;  %v1007_v39 = vadd.bf16 %v943_v24, %v2643_v42 }
 0x1cb   :  { %v816_v40 = vmul.bf16 %v2655_v27, %v2655_v27  ;;  %v1258_v32 = vmul.bf16 1056980736, %v1194_v28  ;;  %v1070_v35 = vmul.bf16 1061961548, %v1006_v0 }
 0x1cc   :  { %v817_v36 = vmul.bf16 %v2659_v15, %v2659_v15  ;;  %v493_v37 = vpop.f32.mrb[80].mxu0  ;;  %v1259_v41 = vmul.bf16 1056980736, %v1195_v29  ;;  %v1071_v46 = vmul.bf16 1061961548, %v1007_v39 }
 0x1cd   :  { %v880_v38 = vmul.bf16 %v816_v40, %v2655_v27  ;;  %v495_v52 = vpop.f32.mrb[81].mxu0  ;;  %2048 = vtanh.bf16 %v1070_v35  ;;  %v1322_v48 = vmul.bf16 %v1258_v32, %v2607_v3 }
 0x1ce   :  { %v881_v44 = vmul.bf16 %v817_v36, %v2659_v15  ;;  %v497_v30 = vpop.f32.mrb[82].mxu0  ;;  %v1323_v50 = vmul.bf16 %v1259_v41, %v2611_v43  ;;  %2050 = vtanh.bf16 %v1071_v46 }
 0x1cf   :  { %v944_v53 = vmul.bf16 1027030327, %v880_v38  ;;  %v652_v45 = vpack.c.bf16 %v497_v30, %v493_v37  ;;  %v499_v47 = vpop.f32.mrb[83].mxu0 }
 0x1d0   :  { %v2045_v13 = vpop.eup %2044  ;;  %v945_v49 = vmul.bf16 1027030327, %v881_v44  ;;  %v653_v59 = vpack.c.bf16 %v499_v47, %v495_v52  ;;  %1649 = vmatprep.mubr.bf16.mxu1 %v1323_v50 }
 0x1d1   :  { %v2047_v51 = vpop.eup %2046  ;;  %v2671_v54 = vadd.bf16 %v2350_v5, %v652_v45  ;;  %1650 = vmatmul.mubr.bf16.gmra.mrb[56].mxu1 %v1322_v48  ;;  %v1196_v55 = vadd.bf16 1065369472, %v2045_v13  ;;  %v1008_v56 = vadd.bf16 %v944_v53, %v2655_v27 }
 0x1d2   :  { %v2675_v43 = vadd.bf16 %v2352_v8, %v653_v59  ;;  %v1197_v57 = vadd.bf16 1065369472, %v2047_v51  ;;  %v1009_v2 = vadd.bf16 %v945_v49, %v2659_v15 }
 0x1d3   :  { %v818_v3 = vmul.bf16 %v2671_v54, %v2671_v54  ;;  %v1260_v58 = vmul.bf16 1056980736, %v1196_v55  ;;  %v1072_v61 = vmul.bf16 1061961548, %v1008_v56 }
 0x1d4   :  { %v819_v62 = vmul.bf16 %v2675_v43, %v2675_v43  ;;  %v503_v63 = vpop.f32.mrb[84].mxu0  ;;  %v1261_v7 = vmul.bf16 1056980736, %v1197_v57  ;;  %v1073_v12 = vmul.bf16 1061961548, %v1009_v2 }
 0x1d5   :  { %v882_v1 = vmul.bf16 %v818_v3, %v2671_v54  ;;  %v505_v4 = vpop.f32.mrb[85].mxu0  ;;  %2052 = vtanh.bf16 %v1072_v61  ;;  %v1324_v17 = vmul.bf16 %v1260_v58, %v2623_v34 }
 0x1d6   :  { %v883_v6 = vmul.bf16 %v819_v62, %v2675_v43  ;;  %v507_v9 = vpop.f32.mrb[86].mxu0  ;;  %v1325_v11 = vmul.bf16 %v1261_v7, %v2627_v14  ;;  %2054 = vtanh.bf16 %v1073_v12 }
 0x1d7   :  { %v946_v20 = vmul.bf16 1027030327, %v882_v1  ;;  %v654_v10 = vpack.c.bf16 %v507_v9, %v503_v63  ;;  %v509_v16 = vpop.f32.mrb[87].mxu0 }
 0x1d8   :  { %v2049_v18 = vpop.eup %2048  ;;  %v947_v31 = vmul.bf16 1027030327, %v883_v6  ;;  %v655_v26 = vpack.c.bf16 %v509_v16, %v505_v4  ;;  %1657 = vmatprep.mubr.bf16.mxu1 %v1325_v11 }
 0x1d9   :  { %v2051_v19 = vpop.eup %2050  ;;  %v2687_v21 = vadd.bf16 %v2350_v5, %v654_v10  ;;  %1658 = vmatmul.mubr.bf16.gmra.mrb[60].mxu1 %v1324_v17  ;;  %v1198_v22 = vadd.bf16 1065369472, %v2049_v18  ;;  %v1010_v23 = vadd.bf16 %v946_v20, %v2671_v54 }
 0x1da   :  { %v2691_v14 = vadd.bf16 %v2352_v8, %v655_v26  ;;  %v1199_v24 = vadd.bf16 1065369472, %v2051_v19  ;;  %v1011_v33 = vadd.bf16 %v947_v31, %v2675_v43 }
 0x1db   :  { %v820_v34 = vmul.bf16 %v2687_v21, %v2687_v21  ;;  %v1262_v25 = vmul.bf16 1056980736, %v1198_v22  ;;  %v1074_v28 = vmul.bf16 1061961548, %v1010_v23 }
 0x1dc   :  { %v821_v0 = vmul.bf16 %v2691_v14, %v2691_v14  ;;  %v513_v29 = vpop.f32.mrb[88].mxu0  ;;  %v1263_v39 = vmul.bf16 1056980736, %v1199_v24  ;;  %v1075_v40 = vmul.bf16 1061961548, %v1011_v33 }
 0x1dd   :  { %v884_v32 = vmul.bf16 %v820_v34, %v2687_v21  ;;  %v515_v35 = vpop.f32.mrb[89].mxu0  ;;  %2056 = vtanh.bf16 %v1074_v28  ;;  %v1326_v44 = vmul.bf16 %v1262_v25, %v2639_v60 }
 0x1de   :  { %v885_v36 = vmul.bf16 %v821_v0, %v2691_v14  ;;  %v517_v37 = vpop.f32.mrb[90].mxu0  ;;  %v1327_v41 = vmul.bf16 %v1263_v39, %v2643_v42  ;;  %2058 = vtanh.bf16 %v1075_v40 }
 0x1df   :  { %v948_v46 = vmul.bf16 1027030327, %v884_v32  ;;  %v656_v38 = vpack.c.bf16 %v517_v37, %v513_v29  ;;  %v519_v52 = vpop.f32.mrb[91].mxu0 }
 0x1e0   :  { %v2053_v30 = vpop.eup %2052  ;;  %v949_v50 = vmul.bf16 1027030327, %v885_v36  ;;  %v657_v53 = vpack.c.bf16 %v519_v52, %v515_v35  ;;  %1665 = vmatprep.mubr.bf16.mxu1 %v1327_v41 }
 0x1e1   :  { %v2055_v45 = vpop.eup %2054  ;;  %v2703_v47 = vadd.bf16 %v2350_v5, %v656_v38  ;;  %1666 = vmatmul.mubr.bf16.gmra.mrb[64].mxu1 %v1326_v44  ;;  %v1200_v48 = vadd.bf16 1065369472, %v2053_v30  ;;  %v1012_v13 = vadd.bf16 %v948_v46, %v2687_v21 }
 0x1e2   :  { %v2707_v42 = vadd.bf16 %v2352_v8, %v657_v53  ;;  %v1201_v49 = vadd.bf16 1065369472, %v2055_v45  ;;  %v1013_v59 = vadd.bf16 %v949_v50, %v2691_v14 }
 0x1e3   :  { %v822_v60 = vmul.bf16 %v2703_v47, %v2703_v47  ;;  %v1264_v51 = vmul.bf16 1056980736, %v1200_v48  ;;  %v1076_v55 = vmul.bf16 1061961548, %v1012_v13 }
 0x1e4   :  { %v823_v56 = vmul.bf16 %v2707_v42, %v2707_v42  ;;  %v523_v57 = vpop.f32.mrb[92].mxu0  ;;  %v1265_v2 = vmul.bf16 1056980736, %v1201_v49  ;;  %v1077_v3 = vmul.bf16 1061961548, %v1013_v59 }
 0x1e5   :  { %v886_v58 = vmul.bf16 %v822_v60, %v2703_v47  ;;  %v525_v61 = vpop.f32.mrb[93].mxu0  ;;  %2060 = vtanh.bf16 %v1076_v55  ;;  %v1328_v6 = vmul.bf16 %v1264_v51, %v2655_v27 }
 0x1e6   :  { %v887_v62 = vmul.bf16 %v823_v56, %v2707_v42  ;;  %v527_v63 = vpop.f32.mrb[94].mxu0  ;;  %v1329_v7 = vmul.bf16 %v1265_v2, %v2659_v15  ;;  %2062 = vtanh.bf16 %v1077_v3 }
 0x1e7   :  { %v950_v12 = vmul.bf16 1027030327, %v886_v58  ;;  %v658_v1 = vpack.c.bf16 %v527_v63, %v523_v57  ;;  %v529_v4 = vpop.f32.mrb[95].mxu0 }
 0x1e8   :  { %v2057_v9 = vpop.eup %2056  ;;  %v951_v11 = vmul.bf16 1027030327, %v887_v62  ;;  %v659_v20 = vpack.c.bf16 %v529_v4, %v525_v61  ;;  %1673 = vmatprep.mubr.bf16.mxu1 %v1329_v7 }
 0x1e9   :  { %v2059_v10 = vpop.eup %2058  ;;  %v2719_v16 = vadd.bf16 %v2350_v5, %v658_v1  ;;  %1674 = vmatmul.mubr.bf16.gmra.mrb[68].mxu1 %v1328_v6  ;;  %v1202_v17 = vadd.bf16 1065369472, %v2057_v9  ;;  %v1014_v18 = vadd.bf16 %v950_v12, %v2703_v47 }
 0x1ea   :  { %v2723_v15 = vadd.bf16 %v2352_v8, %v659_v20  ;;  %v1203_v31 = vadd.bf16 1065369472, %v2059_v10  ;;  %v1015_v26 = vadd.bf16 %v951_v11, %v2707_v42 }
 0x1eb   :  { %v824_v27 = vmul.bf16 %v2719_v16, %v2719_v16  ;;  %v1266_v19 = vmul.bf16 1056980736, %v1202_v17  ;;  %v1078_v22 = vmul.bf16 1061961548, %v1014_v18 }
 0x1ec   :  { %v825_v23 = vmul.bf16 %v2723_v15, %v2723_v15  ;;  %v533_v24 = vpop.f32.mrb[96].mxu0  ;;  %v1267_v33 = vmul.bf16 1056980736, %v1203_v31  ;;  %v1079_v34 = vmul.bf16 1061961548, %v1015_v26 }
 0x1ed   :  { %v888_v25 = vmul.bf16 %v824_v27, %v2719_v16  ;;  %v535_v28 = vpop.f32.mrb[97].mxu0  ;;  %2064 = vtanh.bf16 %v1078_v22  ;;  %v1330_v36 = vmul.bf16 %v1266_v19, %v2671_v54 }
 0x1ee   :  { %v889_v0 = vmul.bf16 %v825_v23, %v2723_v15  ;;  %v537_v29 = vpop.f32.mrb[98].mxu0  ;;  %v1331_v39 = vmul.bf16 %v1267_v33, %v2675_v43  ;;  %2066 = vtanh.bf16 %v1079_v34 }
 0x1ef   :  { %v952_v40 = vmul.bf16 1027030327, %v888_v25  ;;  %v660_v32 = vpack.c.bf16 %v537_v29, %v533_v24  ;;  %v539_v35 = vpop.f32.mrb[99].mxu0 }
 0x1f0   :  { %v2061_v37 = vpop.eup %2060  ;;  %v953_v41 = vmul.bf16 1027030327, %v889_v0  ;;  %v661_v46 = vpack.c.bf16 %v539_v35, %v535_v28  ;;  %1681 = vmatprep.mubr.bf16.mxu1 %v1331_v39 }
 0x1f1   :  { %v2063_v38 = vpop.eup %2062  ;;  %v2735_v52 = vadd.bf16 %v2350_v5, %v660_v32  ;;  %1682 = vmatmul.mubr.bf16.gmra.mrb[72].mxu1 %v1330_v36  ;;  %v1204_v44 = vadd.bf16 1065369472, %v2061_v37  ;;  %v1016_v30 = vadd.bf16 %v952_v40, %v2719_v16 }
 0x1f2   :  { %v2739_v43 = vadd.bf16 %v2352_v8, %v661_v46  ;;  %v1205_v50 = vadd.bf16 1065369472, %v2063_v38  ;;  %v1017_v53 = vadd.bf16 %v953_v41, %v2723_v15 }
 0x1f3   :  { %v826_v54 = vmul.bf16 %v2735_v52, %v2735_v52  ;;  %v1268_v45 = vmul.bf16 1056980736, %v1204_v44  ;;  %v1080_v48 = vmul.bf16 1061961548, %v1016_v30 }
 0x1f4   :  { %v827_v13 = vmul.bf16 %v2739_v43, %v2739_v43  ;;  %v543_v49 = vpop.f32.mrb[100].mxu0  ;;  %v1269_v59 = vmul.bf16 1056980736, %v1205_v50  ;;  %v1081_v60 = vmul.bf16 1061961548, %v1017_v53 }
 0x1f5   :  { %v890_v51 = vmul.bf16 %v826_v54, %v2735_v52  ;;  %v545_v55 = vpop.f32.mrb[101].mxu0  ;;  %2068 = vtanh.bf16 %v1080_v48  ;;  %v1332_v62 = vmul.bf16 %v1268_v45, %v2687_v21 }
 0x1f6   :  { %v891_v56 = vmul.bf16 %v827_v13, %v2739_v43  ;;  %v547_v57 = vpop.f32.mrb[102].mxu0  ;;  %v1333_v2 = vmul.bf16 %v1269_v59, %v2691_v14  ;;  %2070 = vtanh.bf16 %v1081_v60 }
 0x1f7   :  { %v954_v3 = vmul.bf16 1027030327, %v890_v51  ;;  %v662_v58 = vpack.c.bf16 %v547_v57, %v543_v49  ;;  %v549_v61 = vpop.f32.mrb[103].mxu0 }
 0x1f8   :  { %v2065_v63 = vpop.eup %2064  ;;  %v955_v7 = vmul.bf16 1027030327, %v891_v56  ;;  %v663_v12 = vpack.c.bf16 %v549_v61, %v545_v55  ;;  %1689 = vmatprep.mubr.bf16.mxu1 %v1333_v2 }
 0x1f9   :  { %v2067_v1 = vpop.eup %2066  ;;  %v2751_v4 = vadd.bf16 %v2350_v5, %v662_v58  ;;  %1690 = vmatmul.mubr.bf16.gmra.mrb[76].mxu1 %v1332_v62  ;;  %v1206_v6 = vadd.bf16 1065369472, %v2065_v63  ;;  %v1018_v9 = vadd.bf16 %v954_v3, %v2735_v52 }
 0x1fa   :  { %v2755_v14 = vadd.bf16 %v2352_v8, %v663_v12  ;;  %v1207_v11 = vadd.bf16 1065369472, %v2067_v1  ;;  %v1019_v20 = vadd.bf16 %v955_v7, %v2739_v43 }
 0x1fb   :  { %v828_v21 = vmul.bf16 %v2751_v4, %v2751_v4  ;;  %v1270_v10 = vmul.bf16 1056980736, %v1206_v6  ;;  %v1082_v17 = vmul.bf16 1061961548, %v1018_v9 }
 0x1fc   :  { %v829_v18 = vmul.bf16 %v2755_v14, %v2755_v14  ;;  %v553_v31 = vpop.f32.mrb[104].mxu0  ;;  %v1271_v26 = vmul.bf16 1056980736, %v1207_v11  ;;  %v1083_v27 = vmul.bf16 1061961548, %v1019_v20 }
 0x1fd   :  { %v892_v19 = vmul.bf16 %v828_v21, %v2751_v4  ;;  %v555_v22 = vpop.f32.mrb[105].mxu0  ;;  %2072 = vtanh.bf16 %v1082_v17  ;;  %v1334_v0 = vmul.bf16 %v1270_v10, %v2703_v47 }
 0x1fe   :  { %v893_v23 = vmul.bf16 %v829_v18, %v2755_v14  ;;  %v557_v24 = vpop.f32.mrb[106].mxu0  ;;  %v1335_v33 = vmul.bf16 %v1271_v26, %v2707_v42  ;;  %2074 = vtanh.bf16 %v1083_v27 }
 0x1ff   :  { %v956_v34 = vmul.bf16 1027030327, %v892_v19  ;;  %v664_v25 = vpack.c.bf16 %v557_v24, %v553_v31  ;;  %v559_v28 = vpop.f32.mrb[107].mxu0 }
 0x200   :  { %v2069_v29 = vpop.eup %2068  ;;  %v957_v39 = vmul.bf16 1027030327, %v893_v23  ;;  %v665_v40 = vpack.c.bf16 %v559_v28, %v555_v22  ;;  %1697 = vmatprep.mubr.bf16.mxu1 %v1335_v33 }
 0x201   :  { %v2071_v32 = vpop.eup %2070  ;;  %v2767_v35 = vadd.bf16 %v2350_v5, %v664_v25  ;;  %1698 = vmatmul.mubr.bf16.gmra.mrb[80].mxu1 %v1334_v0  ;;  %v1208_v36 = vadd.bf16 1065369472, %v2069_v29  ;;  %v1020_v37 = vadd.bf16 %v956_v34, %v2751_v4 }
 0x202   :  { %v2771_v42 = vadd.bf16 %v2352_v8, %v665_v40  ;;  %v1209_v41 = vadd.bf16 1065369472, %v2071_v32  ;;  %v1021_v46 = vadd.bf16 %v957_v39, %v2755_v14 }
 0x203   :  { %v830_v47 = vmul.bf16 %v2767_v35, %v2767_v35  ;;  %v1272_v38 = vmul.bf16 1056980736, %v1208_v36  ;;  %v1084_v44 = vmul.bf16 1061961548, %v1020_v37 }
 0x204   :  { %v831_v30 = vmul.bf16 %v2771_v42, %v2771_v42  ;;  %v563_v50 = vpop.f32.mrb[108].mxu0  ;;  %v1273_v53 = vmul.bf16 1056980736, %v1209_v41  ;;  %v1085_v54 = vmul.bf16 1061961548, %v1021_v46 }
 0x205   :  { %v894_v45 = vmul.bf16 %v830_v47, %v2767_v35  ;;  %v565_v48 = vpop.f32.mrb[109].mxu0  ;;  %2076 = vtanh.bf16 %v1084_v44  ;;  %v1336_v56 = vmul.bf16 %v1272_v38, %v2719_v16 }
 0x206   :  { %v895_v13 = vmul.bf16 %v831_v30, %v2771_v42  ;;  %v567_v49 = vpop.f32.mrb[110].mxu0  ;;  %v1337_v59 = vmul.bf16 %v1273_v53, %v2723_v15  ;;  %2078 = vtanh.bf16 %v1085_v54 }
 0x207   :  { %v958_v60 = vmul.bf16 1027030327, %v894_v45  ;;  %v666_v51 = vpack.c.bf16 %v567_v49, %v563_v50  ;;  %v569_v55 = vpop.f32.mrb[111].mxu0 }
 0x208   :  { %v2073_v57 = vpop.eup %2072  ;;  %v959_v2 = vmul.bf16 1027030327, %v895_v13  ;;  %v667_v3 = vpack.c.bf16 %v569_v55, %v565_v48  ;;  %1705 = vmatprep.mubr.bf16.mxu1 %v1337_v59 }
 0x209   :  { %v2075_v58 = vpop.eup %2074  ;;  %v2783_v61 = vadd.bf16 %v2350_v5, %v666_v51  ;;  %1706 = vmatmul.mubr.bf16.gmra.mrb[84].mxu1 %v1336_v56  ;;  %v1210_v62 = vadd.bf16 1065369472, %v2073_v57  ;;  %v1022_v63 = vadd.bf16 %v958_v60, %v2767_v35 }
 0x20a   :  { %v2787_v15 = vadd.bf16 %v2352_v8, %v667_v3  ;;  %v1211_v7 = vadd.bf16 1065369472, %v2075_v58  ;;  %v1023_v12 = vadd.bf16 %v959_v2, %v2771_v42 }
 0x20b   :  { %v832_v16 = vmul.bf16 %v2783_v61, %v2783_v61  ;;  %v1274_v1 = vmul.bf16 1056980736, %v1210_v62  ;;  %v1086_v6 = vmul.bf16 1061961548, %v1022_v63 }
 0x20c   :  { %v833_v9 = vmul.bf16 %v2787_v15, %v2787_v15  ;;  %v573_v11 = vpop.f32.mrb[112].mxu0  ;;  %v1275_v20 = vmul.bf16 1056980736, %v1211_v7  ;;  %v1087_v21 = vmul.bf16 1061961548, %v1023_v12 }
 0x20d   :  { %v896_v10 = vmul.bf16 %v832_v16, %v2783_v61  ;;  %v575_v17 = vpop.f32.mrb[113].mxu0  ;;  %2080 = vtanh.bf16 %v1086_v6  ;;  %v1338_v23 = vmul.bf16 %v1274_v1, %v2735_v52 }
 0x20e   :  { %v897_v18 = vmul.bf16 %v833_v9, %v2787_v15  ;;  %v577_v31 = vpop.f32.mrb[114].mxu0  ;;  %v1339_v26 = vmul.bf16 %v1275_v20, %v2739_v43  ;;  %2082 = vtanh.bf16 %v1087_v21 }
 0x20f   :  { %v960_v27 = vmul.bf16 1027030327, %v896_v10  ;;  %v668_v19 = vpack.c.bf16 %v577_v31, %v573_v11  ;;  %v579_v22 = vpop.f32.mrb[115].mxu0 }
 0x210   :  { %v2077_v24 = vpop.eup %2076  ;;  %v961_v33 = vmul.bf16 1027030327, %v897_v18  ;;  %v669_v34 = vpack.c.bf16 %v579_v22, %v575_v17  ;;  %1713 = vmatprep.mubr.bf16.mxu1 %v1339_v26 }
 0x211   :  { %v2079_v25 = vpop.eup %2078  ;;  %v2799_v28 = vadd.bf16 %v2350_v5, %v668_v19  ;;  %1714 = vmatmul.mubr.bf16.gmra.mrb[88].mxu1 %v1338_v23  ;;  %v1212_v0 = vadd.bf16 1065369472, %v2077_v24  ;;  %v1024_v29 = vadd.bf16 %v960_v27, %v2783_v61 }
 0x212   :  { %v2803_v43 = vadd.bf16 %v2352_v8, %v669_v34  ;;  %v1213_v39 = vadd.bf16 1065369472, %v2079_v25  ;;  %v1025_v40 = vadd.bf16 %v961_v33, %v2787_v15 }
 0x213   :  { %v834_v52 = vmul.bf16 %v2799_v28, %v2799_v28  ;;  %v1276_v32 = vmul.bf16 1056980736, %v1212_v0  ;;  %v1088_v36 = vmul.bf16 1061961548, %v1024_v29 }
 0x214   :  { %v835_v37 = vmul.bf16 %v2803_v43, %v2803_v43  ;;  %v583_v41 = vpop.f32.mrb[116].mxu0  ;;  %v1277_v46 = vmul.bf16 1056980736, %v1213_v39  ;;  %v1089_v47 = vmul.bf16 1061961548, %v1025_v40 }
 0x215   :  { %v898_v38 = vmul.bf16 %v834_v52, %v2799_v28  ;;  %v585_v44 = vpop.f32.mrb[117].mxu0  ;;  %2084 = vtanh.bf16 %v1088_v36  ;;  %v1340_v13 = vmul.bf16 %v1276_v32, %v2751_v4 }
 0x216   :  { %v899_v30 = vmul.bf16 %v835_v37, %v2803_v43  ;;  %v587_v50 = vpop.f32.mrb[118].mxu0  ;;  %v1341_v53 = vmul.bf16 %v1277_v46, %v2755_v14  ;;  %2086 = vtanh.bf16 %v1089_v47 }
 0x217   :  { %v962_v54 = vmul.bf16 1027030327, %v898_v38  ;;  %v670_v45 = vpack.c.bf16 %v587_v50, %v583_v41  ;;  %v589_v48 = vpop.f32.mrb[119].mxu0 }
 0x218   :  { %v2081_v49 = vpop.eup %2080  ;;  %v963_v59 = vmul.bf16 1027030327, %v899_v30  ;;  %v671_v60 = vpack.c.bf16 %v589_v48, %v585_v44  ;;  %1721 = vmatprep.mubr.bf16.mxu1 %v1341_v53 }
 0x219   :  { %v2083_v51 = vpop.eup %2082  ;;  %v2815_v55 = vadd.bf16 %v2350_v5, %v670_v45  ;;  %1722 = vmatmul.mubr.bf16.gmra.mrb[92].mxu1 %v1340_v13  ;;  %v1214_v56 = vadd.bf16 1065369472, %v2081_v49  ;;  %v1026_v57 = vadd.bf16 %v962_v54, %v2799_v28 }
 0x21a   :  { %v2819_v14 = vadd.bf16 %v2352_v8, %v671_v60  ;;  %v1215_v2 = vadd.bf16 1065369472, %v2083_v51  ;;  %v1027_v3 = vadd.bf16 %v963_v59, %v2803_v43  ;;  %v2856_v59 = vld [vmem:[%s2958_s4] ss:$0 sm:$0xff]  ;;  %s2207_s4 = smov [#allocation8]  }
 0x21b   :  { %v836_v4 = vmul.bf16 %v2815_v55, %v2815_v55  ;;  %v1278_v58 = vmul.bf16 1056980736, %v1214_v56  ;;  %v1090_v62 = vmul.bf16 1061961548, %v1026_v57  ;;  %s1847_s10 = sshll.u32 %s2207_s4, 4  ;;  %s1848_s10 = int_to_ptr.vmem [resolvable:$true] %s1847_s10 }
 0x21c   :  { %v837_v63 = vmul.bf16 %v2819_v14, %v2819_v14  ;;  %v593_v7 = vpop.f32.mrb[120].mxu0  ;;  %v1279_v12 = vmul.bf16 1056980736, %v1215_v2  ;;  %v1091_v16 = vmul.bf16 1061961548, %v1027_v3  ;;  %p2175_p11 = scmp.lt.s32.totalorder %s1848_s10, %s1848_s10 }
 0x21d   :  { %v900_v1 = vmul.bf16 %v836_v4, %v2815_v55  ;;  %v595_v6 = vpop.f32.mrb[121].mxu0  ;;  %2088 = vtanh.bf16 %v1090_v62  ;;  %v1342_v18 = vmul.bf16 %v1278_v58, %v2767_v35  ;;  %s2170_s11 = scalar_lea.vmem %s1848_s10, 8192 }
 0x21e   :  { %v901_v9 = vmul.bf16 %v837_v63, %v2819_v14  ;;  %v597_v11 = vpop.f32.mrb[122].mxu0  ;;  %v1343_v20 = vmul.bf16 %v1279_v12, %v2771_v42  ;;  %2090 = vtanh.bf16 %v1091_v16  ;;  %p2171_p10 = scmp.ne.s32.totalorder %s1848_s10, %s2170_s11  ;;  %p2176_p12 = scmp.lt.s32.totalorder %s2170_s11, %s2170_s11 }
 0x21f   :  { %v964_v21 = vmul.bf16 1027030327, %v900_v1  ;;  %v672_v10 = vpack.c.bf16 %v597_v11, %v593_v7  ;;  %v599_v17 = vpop.f32.mrb[123].mxu0 }
 0x220   :  { %v2085_v31 = vpop.eup %2084  ;;  %v965_v26 = vmul.bf16 1027030327, %v901_v9  ;;  %v673_v27 = vpack.c.bf16 %v599_v17, %v595_v6  ;;  %1729 = vmatprep.mubr.bf16.mxu1 %v1343_v20  ;;  %p2177_p13 = por %p2176_p12, %p2175_p11 }
 0x221   :  { %v2087_v19 = vpop.eup %2086  ;;  %v2831_v22 = vadd.bf16 %v2350_v5, %v672_v10  ;;  %1730 = vmatmul.mubr.bf16.gmra.mrb[96].mxu1 %v1342_v18  ;;  %v1216_v23 = vadd.bf16 1065369472, %v2085_v31  ;;  %v1028_v24 = vadd.bf16 %v964_v21, %v2815_v55 }
 0x222   :  { %v2835_v42 = vadd.bf16 %v2352_v8, %v673_v27  ;;  %v1217_v33 = vadd.bf16 1065369472, %v2087_v19  ;;  %v1029_v34 = vadd.bf16 %v965_v26, %v2819_v14  ;;  %p2178_p0 = pnand %p2177_p13, %p2171_p10 }
 0x223   :  { %v838_v35 = vmul.bf16 %v2831_v22, %v2831_v22  ;;  %v1280_v25 = vmul.bf16 1056980736, %v1216_v23  ;;  %v1092_v0 = vmul.bf16 1061961548, %v1028_v24 }
 0x224   :  { %v839_v29 = vmul.bf16 %v2835_v42, %v2835_v42  ;;  %v603_v39 = vpop.f32.mrb[124].mxu0  ;;  %v1281_v40 = vmul.bf16 1056980736, %v1217_v33  ;;  %v1093_v52 = vmul.bf16 1061961548, %v1029_v34 }
 0x225   :  { %v902_v32 = vmul.bf16 %v838_v35, %v2831_v22  ;;  %v605_v36 = vpop.f32.mrb[125].mxu0  ;;  %2092 = vtanh.bf16 %v1092_v0  ;;  %v1344_v30 = vmul.bf16 %v1280_v25, %v2783_v61 }
 0x226   :  { %v903_v37 = vmul.bf16 %v839_v29, %v2835_v42  ;;  %v607_v41 = vpop.f32.mrb[126].mxu0  ;;  %v1345_v46 = vmul.bf16 %v1281_v40, %v2787_v15  ;;  %2094 = vtanh.bf16 %v1093_v52 }
 0x227   :  { %v966_v47 = vmul.bf16 1027030327, %v902_v32  ;;  %v674_v38 = vpack.c.bf16 %v607_v41, %v603_v39  ;;  %v609_v44 = vpop.f32.mrb[127].mxu0 }
 0x228   :  { %v2089_v50 = vpop.eup %2088  ;;  %v967_v53 = vmul.bf16 1027030327, %v903_v37  ;;  %v675_v54 = vpack.c.bf16 %v609_v44, %v605_v36  ;;  %1737 = vmatprep.mubr.bf16.mxu1 %v1345_v46 }
 0x229   :  { %v2091_v45 = vpop.eup %2090  ;;  %v2847_v48 = vadd.bf16 %v2350_v5, %v674_v38  ;;  %1738 = vmatmul.mubr.bf16.gmra.mrb[100].mxu1 %v1344_v30  ;;  %v1218_v13 = vadd.bf16 1065369472, %v2089_v50  ;;  %v1030_v49 = vadd.bf16 %v966_v47, %v2831_v22 }
 0x22a   :  { %v2851_v15 = vadd.bf16 %v2352_v8, %v675_v54  ;;  %v1219_v61 = vadd.bf16 1065369472, %v2091_v45  ;;  %v1031_v60 = vadd.bf16 %v967_v53, %v2835_v42 }
 0x22b   :  { %v840_v51 = vmul.bf16 %v2847_v48, %v2847_v48  ;;  %v1282_v5 = vmul.bf16 1056980736, %v1218_v13  ;;  %v1094_v56 = vmul.bf16 1061961548, %v1030_v49 }
 0x22c   :  { %v841_v57 = vmul.bf16 %v2851_v15, %v2851_v15  ;;  %v1523_v2 = vpop.f32.mrb[128].mxu0  ;;  %v1283_v3 = vmul.bf16 1056980736, %v1219_v61  ;;  %v1095_v8 = vmul.bf16 1061961548, %v1031_v60 }
 0x22d   :  { %v904_v4 = vmul.bf16 %v840_v51, %v2847_v48  ;;  %v1524_v58 = vadd.f32 %v2856_v59, %v1523_v2  ;;  %v1525_v62 = vpop.f32.mrb[129].mxu0  ;;  %2096 = vtanh.bf16 %v1094_v56  ;;  %v1346_v9 = vmul.bf16 %v1282_v5, %v2799_v28 }
 0x22e   :  { %v905_v63 = vmul.bf16 %v841_v57, %v2851_v15  ;;  %v1526_v7 = vpop.f32.mrb[130].mxu0  ;;  %v1347_v12 = vmul.bf16 %v1283_v3, %v2803_v43  ;;  %2098 = vtanh.bf16 %v1095_v8 }
 0x22f   :  { %v968_v16 = vmul.bf16 1027030327, %v904_v4  ;;  %1778 = vst [vmem:[#allocation8] sm:$0xff] %v1524_v58  ;;  %v1527_v1 = vadd.f32 %v2856_v59, %v1526_v7  ;;  %v1528_v6 = vpop.f32.mrb[131].mxu0 }
 0x230   :  { %v2093_v11 = vpop.eup %2092  ;;  %v969_v20 = vmul.bf16 1027030327, %v905_v63  ;;  %1745 = vmatprep.mubr.bf16.mxu1 %v1347_v12 }
 0x231   :  { %v2095_v21 = vpop.eup %2094  ;;  %1779 = vst [vmem:[#allocation8 + $0x8] sm:$0xff] %v1527_v1  ;;  %1746 = vmatmul.mubr.bf16.gmra.mrb[104].mxu1 %v1346_v9  ;;  %v1220_v10 = vadd.bf16 1065369472, %v2093_v11  ;;  %v1032_v17 = vadd.bf16 %v968_v16, %v2847_v48 }
 0x232   :  { %v1221_v18 = vadd.bf16 1065369472, %v2095_v21  ;;  %v1033_v43 = vadd.bf16 %v969_v20, %v2851_v15 }
 0x233   :  { %v1284_v31 = vmul.bf16 1056980736, %v1220_v10  ;;  %v1096_v26 = vmul.bf16 1061961548, %v1032_v17 }
 0x234   :  { %v1531_v27 = vpop.f32.mrb[132].mxu0  ;;  %v1539_v19 = vpop.f32.mrb[0].mxu1  ;;  %v1285_v23 = vmul.bf16 1056980736, %v1221_v18  ;;  %v1097_v24 = vmul.bf16 1061961548, %v1033_v43 }
 0x235   :  { %v1532_v28 = vadd.f32 %v2856_v59, %v1531_v27  ;;  %v1540_v33 = vadd.f32 %v2856_v59, %v1539_v19  ;;  %v1533_v34 = vpop.f32.mrb[133].mxu0  ;;  %v1541_v35 = vpop.f32.mrb[1].mxu1  ;;  %2100 = vtanh.bf16 %v1096_v26  ;;  %v1348_v36 = vmul.bf16 %v1284_v31, %v2815_v55 }
 0x236   :  { %v1534_v25 = vpop.f32.mrb[134].mxu0  ;;  %v1542_v0 = vpop.f32.mrb[2].mxu1  ;;  %v1349_v29 = vmul.bf16 %v1285_v23, %v2819_v14  ;;  %2102 = vtanh.bf16 %v1097_v24 }
 0x237   :  { %1780 = vst [vmem:[#allocation8 + $0x10] sm:$0xff] %v1532_v28  ;;  %1782 = vst [vmem:[#allocation8 + $0x20] sm:$0xff] %v1540_v33  ;;  %v1535_v39 = vadd.f32 %v2856_v59, %v1534_v25  ;;  %v1543_v40 = vadd.f32 %v2856_v59, %v1542_v0  ;;  %v1536_v52 = vpop.f32.mrb[135].mxu0  ;;  %v1544_v32 = vpop.f32.mrb[3].mxu1 }
 0x238   :  { %v2097_v37 = vpop.eup %2096  ;;  %1753 = vmatprep.mubr.bf16.mxu1 %v1349_v29 }
 0x239   :  { %v2099_v41 = vpop.eup %2098  ;;  %1781 = vst [vmem:[#allocation8 + $0x18] sm:$0xff] %v1535_v39  ;;  %1783 = vst [vmem:[#allocation8 + $0x28] sm:$0xff] %v1543_v40  ;;  %1754 = vmatmul.mubr.bf16.gmra.mrb[108].mxu1 %v1348_v36  ;;  %v1222_v46 = vadd.bf16 1065369472, %v2097_v37 }
 0x23a   :  { %v1223_v47 = vadd.bf16 1065369472, %v2099_v41 }
 0x23b   :  { %v1286_v14 = vmul.bf16 1056980736, %v1222_v46 }
 0x23c   :  { %v1547_v38 = vpop.f32.mrb[4].mxu1  ;;  %v1287_v44 = vmul.bf16 1056980736, %v1223_v47 }
 0x23d   :  { %v1548_v30 = vadd.f32 %v2856_v59, %v1547_v38  ;;  %v1549_v50 = vpop.f32.mrb[5].mxu1  ;;  %v1350_v13 = vmul.bf16 %v1286_v14, %v2831_v22 }
 0x23e   :  { %v1550_v53 = vpop.f32.mrb[6].mxu1  ;;  %v1351_v54 = vmul.bf16 %v1287_v44, %v2835_v42 }
 0x23f   :  { %1784 = vst [vmem:[#allocation8 + $0x30] sm:$0xff] %v1548_v30  ;;  %v1551_v55 = vadd.f32 %v2856_v59, %v1550_v53  ;;  %v1552_v45 = vpop.f32.mrb[7].mxu1 }
 0x240   :  { %v2101_v49 = vpop.eup %2100  ;;  %1761 = vmatprep.mubr.bf16.mxu1 %v1351_v54 }
 0x241   :  { %v2103_v61 = vpop.eup %2102  ;;  %1785 = vst [vmem:[#allocation8 + $0x38] sm:$0xff] %v1551_v55  ;;  %1762 = vmatmul.mubr.bf16.gmra.mrb[112].mxu1 %v1350_v13  ;;  %v1224_v60 = vadd.bf16 1065369472, %v2101_v49 }
 0x242   :  { %v1225_v51 = vadd.bf16 1065369472, %v2103_v61 }
 0x243   :  { %v1288_v5 = vmul.bf16 1056980736, %v1224_v60 }
 0x244   :  { %v1555_v56 = vpop.f32.mrb[8].mxu1  ;;  %v1289_v57 = vmul.bf16 1056980736, %v1225_v51 }
 0x245   :  { %v1556_v2 = vadd.f32 %v2856_v59, %v1555_v56  ;;  %v1557_v3 = vpop.f32.mrb[9].mxu1  ;;  %v1352_v58 = vmul.bf16 %v1288_v5, %v2847_v48 }
 0x246   :  { %v1558_v42 = vpop.f32.mrb[10].mxu1  ;;  %v1353_v8 = vmul.bf16 %v1289_v57, %v2851_v15 }
 0x247   :  { %1786 = vst [vmem:[#allocation8 + $0x40] sm:$0xff] %v1556_v2  ;;  %v1559_v4 = vadd.f32 %v2856_v59, %v1558_v42  ;;  %v1560_v22 = vpop.f32.mrb[11].mxu1 }
 0x248   :  { %1769 = vmatprep.mubr.bf16.mxu1 %v1353_v8 }
 0x249   :  { %1787 = vst [vmem:[#allocation8 + $0x48] sm:$0xff] %v1559_v4  ;;  %1770 = vmatmul.mubr.bf16.gmra.mrb[116].mxu1 %v1352_v58 }
 0x24c   :  { %v1563_v62 = vpop.f32.mrb[12].mxu1 }
 0x24d   :  { %v1564_v63 = vadd.f32 %v2856_v59, %v1563_v62  ;;  %v1565_v7 = vpop.f32.mrb[13].mxu1 }
 0x24e   :  { %v1566_v12 = vpop.f32.mrb[14].mxu1 }
 0x24f   :  { %1788 = vst [vmem:[#allocation8 + $0x50] sm:$0xff] %v1564_v63  ;;  %v1567_v16 = vadd.f32 %v2856_v59, %v1566_v12  ;;  %v1568_v1 = vpop.f32.mrb[15].mxu1 }
 0x251   :  { %1789 = vst [vmem:[#allocation8 + $0x58] sm:$0xff] %v1567_v16 }
 0x254   :  { %v1571_v15 = vpop.f32.mrb[16].mxu1 }
 0x255   :  { %v1572_v6 = vadd.f32 %v2856_v59, %v1571_v15  ;;  %v1573_v9 = vpop.f32.mrb[17].mxu1 }
 0x256   :  { %v1574_v11 = vpop.f32.mrb[18].mxu1 }
 0x257   :  { %1790 = vst [vmem:[#allocation8 + $0x60] sm:$0xff] %v1572_v6  ;;  %v1575_v48 = vadd.f32 %v2856_v59, %v1574_v11  ;;  %v1576_v20 = vpop.f32.mrb[19].mxu1 }
 0x259   :  { %1791 = vst [vmem:[#allocation8 + $0x68] sm:$0xff] %v1575_v48 }
 0x25c   :  { %v1579_v21 = vpop.f32.mrb[20].mxu1 }
 0x25d   :  { %v1580_v10 = vadd.f32 %v2856_v59, %v1579_v21  ;;  %v1581_v17 = vpop.f32.mrb[21].mxu1 }
 0x25e   :  { %v1582_v18 = vpop.f32.mrb[22].mxu1 }
 0x25f   :  { %1792 = vst [vmem:[#allocation8 + $0x70] sm:$0xff] %v1580_v10  ;;  %v1583_v43 = vadd.f32 %v2856_v59, %v1582_v18  ;;  %v1584_v31 = vpop.f32.mrb[23].mxu1 }
 0x261   :  { %1793 = vst [vmem:[#allocation8 + $0x78] sm:$0xff] %v1583_v43 }
 0x264   :  { %v1587_v26 = vpop.f32.mrb[24].mxu1 }
 0x265   :  { %v1588_v27 = vadd.f32 %v2856_v59, %v1587_v26  ;;  %v1589_v19 = vpop.f32.mrb[25].mxu1 }
 0x266   :  { %v1590_v23 = vpop.f32.mrb[26].mxu1 }
 0x267   :  { %1794 = vst [vmem:[#allocation8 + $0x80] sm:$0xff] %v1588_v27  ;;  %v1591_v24 = vadd.f32 %v2856_v59, %v1590_v23  ;;  %v1592_v28 = vpop.f32.mrb[27].mxu1 }
 0x269   :  { %1795 = vst [vmem:[#allocation8 + $0x88] sm:$0xff] %v1591_v24 }
 0x26c   :  { %v1595_v33 = vpop.f32.mrb[28].mxu1 }
 0x26d   :  { %v1596_v34 = vadd.f32 %v2856_v59, %v1595_v33  ;;  %v1597_v35 = vpop.f32.mrb[29].mxu1 }
 0x26e   :  { %v1598_v25 = vpop.f32.mrb[30].mxu1 }
 0x26f   :  { %1796 = vst [vmem:[#allocation8 + $0x90] sm:$0xff] %v1596_v34  ;;  %v1599_v0 = vadd.f32 %v2856_v59, %v1598_v25  ;;  %v1600_v29 = vpop.f32.mrb[31].mxu1 }
 0x271   :  { %1797 = vst [vmem:[#allocation8 + $0x98] sm:$0xff] %v1599_v0 }
 0x274   :  { %v1603_v39 = vpop.f32.mrb[32].mxu1 }
 0x275   :  { %v1604_v40 = vadd.f32 %v2856_v59, %v1603_v39  ;;  %v1605_v52 = vpop.f32.mrb[33].mxu1 }
 0x276   :  { %v1606_v32 = vpop.f32.mrb[34].mxu1 }
 0x277   :  { %1798 = vst [vmem:[#allocation8 + $0xa0] sm:$0xff] %v1604_v40  ;;  %v1607_v36 = vadd.f32 %v2856_v59, %v1606_v32  ;;  %v1608_v37 = vpop.f32.mrb[35].mxu1 }
 0x279   :  { %1799 = vst [vmem:[#allocation8 + $0xa8] sm:$0xff] %v1607_v36 }
 0x27c   :  { %v1611_v41 = vpop.f32.mrb[36].mxu1 }
 0x27d   :  { %v1612_v46 = vadd.f32 %v2856_v59, %v1611_v41  ;;  %v1613_v47 = vpop.f32.mrb[37].mxu1 }
 0x27e   :  { %v1614_v14 = vpop.f32.mrb[38].mxu1 }
 0x27f   :  { %1800 = vst [vmem:[#allocation8 + $0xb0] sm:$0xff] %v1612_v46  ;;  %v1615_v38 = vadd.f32 %v2856_v59, %v1614_v14  ;;  %v1616_v44 = vpop.f32.mrb[39].mxu1 }
 0x281   :  { %1801 = vst [vmem:[#allocation8 + $0xb8] sm:$0xff] %v1615_v38 }
 0x284   :  { %v1619_v30 = vpop.f32.mrb[40].mxu1 }
 0x285   :  { %v1620_v50 = vadd.f32 %v2856_v59, %v1619_v30  ;;  %v1621_v53 = vpop.f32.mrb[41].mxu1 }
 0x286   :  { %v1622_v54 = vpop.f32.mrb[42].mxu1 }
 0x287   :  { %1802 = vst [vmem:[#allocation8 + $0xc0] sm:$0xff] %v1620_v50  ;;  %v1623_v55 = vadd.f32 %v2856_v59, %v1622_v54  ;;  %v1624_v45 = vpop.f32.mrb[43].mxu1 }
 0x289   :  { %1803 = vst [vmem:[#allocation8 + $0xc8] sm:$0xff] %v1623_v55 }
 0x28c   :  { %v1627_v13 = vpop.f32.mrb[44].mxu1 }
 0x28d   :  { %v1628_v49 = vadd.f32 %v2856_v59, %v1627_v13  ;;  %v1629_v61 = vpop.f32.mrb[45].mxu1 }
 0x28e   :  { %v1630_v60 = vpop.f32.mrb[46].mxu1 }
 0x28f   :  { %1804 = vst [vmem:[#allocation8 + $0xd0] sm:$0xff] %v1628_v49  ;;  %v1631_v51 = vadd.f32 %v2856_v59, %v1630_v60  ;;  %v1632_v5 = vpop.f32.mrb[47].mxu1 }
 0x291   :  { %1805 = vst [vmem:[#allocation8 + $0xd8] sm:$0xff] %v1631_v51 }
 0x294   :  { %v1635_v56 = vpop.f32.mrb[48].mxu1 }
 0x295   :  { %v1636_v57 = vadd.f32 %v2856_v59, %v1635_v56  ;;  %v1637_v2 = vpop.f32.mrb[49].mxu1 }
 0x296   :  { %v1638_v3 = vpop.f32.mrb[50].mxu1 }
 0x297   :  { %1806 = vst [vmem:[#allocation8 + $0xe0] sm:$0xff] %v1636_v57  ;;  %v1639_v42 = vadd.f32 %v2856_v59, %v1638_v3  ;;  %v1640_v8 = vpop.f32.mrb[51].mxu1 }
 0x299   :  { %1807 = vst [vmem:[#allocation8 + $0xe8] sm:$0xff] %v1639_v42 }
 0x29c   :  { %v1643_v4 = vpop.f32.mrb[52].mxu1 }
 0x29d   :  { %v1644_v22 = vadd.f32 %v2856_v59, %v1643_v4  ;;  %v1645_v58 = vpop.f32.mrb[53].mxu1 }
 0x29e   :  { %v1646_v62 = vpop.f32.mrb[54].mxu1 }
 0x29f   :  { %1808 = vst [vmem:[#allocation8 + $0xf0] sm:$0xff] %v1644_v22  ;;  %v1647_v63 = vadd.f32 %v2856_v59, %v1646_v62  ;;  %v1648_v7 = vpop.f32.mrb[55].mxu1 }
 0x2a1   :  { %1809 = vst [vmem:[#allocation8 + $0xf8] sm:$0xff] %v1647_v63 }
 0x2a4   :  { %v1651_v12 = vpop.f32.mrb[56].mxu1 }
 0x2a5   :  { %v1652_v16 = vadd.f32 %v2856_v59, %v1651_v12  ;;  %v1653_v1 = vpop.f32.mrb[57].mxu1 }
 0x2a6   :  { %v1654_v15 = vpop.f32.mrb[58].mxu1 }
 0x2a7   :  { %1810 = vst [vmem:[#allocation8 + $0x100] sm:$0xff] %v1652_v16  ;;  %v1655_v6 = vadd.f32 %v2856_v59, %v1654_v15  ;;  %v1656_v9 = vpop.f32.mrb[59].mxu1 }
 0x2a9   :  { %1811 = vst [vmem:[#allocation8 + $0x108] sm:$0xff] %v1655_v6 }
 0x2ac   :  { %v1659_v11 = vpop.f32.mrb[60].mxu1 }
 0x2ad   :  { %v1660_v48 = vadd.f32 %v2856_v59, %v1659_v11  ;;  %v1661_v20 = vpop.f32.mrb[61].mxu1 }
 0x2ae   :  { %v1662_v21 = vpop.f32.mrb[62].mxu1 }
 0x2af   :  { %1812 = vst [vmem:[#allocation8 + $0x110] sm:$0xff] %v1660_v48  ;;  %v1663_v10 = vadd.f32 %v2856_v59, %v1662_v21  ;;  %v1664_v17 = vpop.f32.mrb[63].mxu1 }
 0x2b1   :  { %1813 = vst [vmem:[#allocation8 + $0x118] sm:$0xff] %v1663_v10 }
 0x2b4   :  { %v1667_v18 = vpop.f32.mrb[64].mxu1 }
 0x2b5   :  { %v1668_v43 = vadd.f32 %v2856_v59, %v1667_v18  ;;  %v1669_v31 = vpop.f32.mrb[65].mxu1 }
 0x2b6   :  { %v1670_v26 = vpop.f32.mrb[66].mxu1 }
 0x2b7   :  { %1814 = vst [vmem:[#allocation8 + $0x120] sm:$0xff] %v1668_v43  ;;  %v1671_v27 = vadd.f32 %v2856_v59, %v1670_v26  ;;  %v1672_v19 = vpop.f32.mrb[67].mxu1 }
 0x2b9   :  { %1815 = vst [vmem:[#allocation8 + $0x128] sm:$0xff] %v1671_v27 }
 0x2bc   :  { %v1675_v23 = vpop.f32.mrb[68].mxu1 }
 0x2bd   :  { %v1676_v24 = vadd.f32 %v2856_v59, %v1675_v23  ;;  %v1677_v28 = vpop.f32.mrb[69].mxu1 }
 0x2be   :  { %v1678_v33 = vpop.f32.mrb[70].mxu1 }
 0x2bf   :  { %1816 = vst [vmem:[#allocation8 + $0x130] sm:$0xff] %v1676_v24  ;;  %v1679_v34 = vadd.f32 %v2856_v59, %v1678_v33  ;;  %v1680_v35 = vpop.f32.mrb[71].mxu1 }
 0x2c1   :  { %1817 = vst [vmem:[#allocation8 + $0x138] sm:$0xff] %v1679_v34 }
 0x2c4   :  { %v1683_v25 = vpop.f32.mrb[72].mxu1 }
 0x2c5   :  { %v1684_v0 = vadd.f32 %v2856_v59, %v1683_v25  ;;  %v1685_v29 = vpop.f32.mrb[73].mxu1 }
 0x2c6   :  { %v1686_v39 = vpop.f32.mrb[74].mxu1 }
 0x2c7   :  { %1818 = vst [vmem:[#allocation8 + $0x140] sm:$0xff] %v1684_v0  ;;  %v1687_v40 = vadd.f32 %v2856_v59, %v1686_v39  ;;  %v1688_v52 = vpop.f32.mrb[75].mxu1 }
 0x2c9   :  { %1819 = vst [vmem:[#allocation8 + $0x148] sm:$0xff] %v1687_v40 }
 0x2cc   :  { %v1691_v32 = vpop.f32.mrb[76].mxu1 }
 0x2cd   :  { %v1692_v36 = vadd.f32 %v2856_v59, %v1691_v32  ;;  %v1693_v37 = vpop.f32.mrb[77].mxu1 }
 0x2ce   :  { %v1694_v41 = vpop.f32.mrb[78].mxu1 }
 0x2cf   :  { %1820 = vst [vmem:[#allocation8 + $0x150] sm:$0xff] %v1692_v36  ;;  %v1695_v46 = vadd.f32 %v2856_v59, %v1694_v41  ;;  %v1696_v47 = vpop.f32.mrb[79].mxu1 }
 0x2d1   :  { %1821 = vst [vmem:[#allocation8 + $0x158] sm:$0xff] %v1695_v46 }
 0x2d4   :  { %v1699_v14 = vpop.f32.mrb[80].mxu1 }
 0x2d5   :  { %v1700_v38 = vadd.f32 %v2856_v59, %v1699_v14  ;;  %v1701_v44 = vpop.f32.mrb[81].mxu1 }
 0x2d6   :  { %v1702_v30 = vpop.f32.mrb[82].mxu1 }
 0x2d7   :  { %1822 = vst [vmem:[#allocation8 + $0x160] sm:$0xff] %v1700_v38  ;;  %v1703_v50 = vadd.f32 %v2856_v59, %v1702_v30  ;;  %v1704_v53 = vpop.f32.mrb[83].mxu1 }
 0x2d9   :  { %1823 = vst [vmem:[#allocation8 + $0x168] sm:$0xff] %v1703_v50 }
 0x2dc   :  { %v1707_v54 = vpop.f32.mrb[84].mxu1 }
 0x2dd   :  { %v1708_v55 = vadd.f32 %v2856_v59, %v1707_v54  ;;  %v1709_v45 = vpop.f32.mrb[85].mxu1 }
 0x2de   :  { %v1710_v13 = vpop.f32.mrb[86].mxu1 }
 0x2df   :  { %1824 = vst [vmem:[#allocation8 + $0x170] sm:$0xff] %v1708_v55  ;;  %v1711_v49 = vadd.f32 %v2856_v59, %v1710_v13  ;;  %v1712_v61 = vpop.f32.mrb[87].mxu1 }
 0x2e1   :  { %1825 = vst [vmem:[#allocation8 + $0x178] sm:$0xff] %v1711_v49 }
 0x2e4   :  { %v1715_v60 = vpop.f32.mrb[88].mxu1 }
 0x2e5   :  { %v1716_v51 = vadd.f32 %v2856_v59, %v1715_v60  ;;  %v1717_v5 = vpop.f32.mrb[89].mxu1 }
 0x2e6   :  { %v1718_v56 = vpop.f32.mrb[90].mxu1 }
 0x2e7   :  { %1826 = vst [vmem:[#allocation8 + $0x180] sm:$0xff] %v1716_v51  ;;  %v1719_v57 = vadd.f32 %v2856_v59, %v1718_v56  ;;  %v1720_v2 = vpop.f32.mrb[91].mxu1 }
 0x2e9   :  { %1827 = vst [vmem:[#allocation8 + $0x188] sm:$0xff] %v1719_v57 }
 0x2ec   :  { %v1723_v3 = vpop.f32.mrb[92].mxu1 }
 0x2ed   :  { %v1724_v42 = vadd.f32 %v2856_v59, %v1723_v3  ;;  %v1725_v8 = vpop.f32.mrb[93].mxu1 }
 0x2ee   :  { %v1726_v4 = vpop.f32.mrb[94].mxu1 }
 0x2ef   :  { %1828 = vst [vmem:[#allocation8 + $0x190] sm:$0xff] %v1724_v42  ;;  %v1727_v22 = vadd.f32 %v2856_v59, %v1726_v4  ;;  %v1728_v58 = vpop.f32.mrb[95].mxu1 }
 0x2f1   :  { %1829 = vst [vmem:[#allocation8 + $0x198] sm:$0xff] %v1727_v22 }
 0x2f4   :  { %v1731_v62 = vpop.f32.mrb[96].mxu1 }
 0x2f5   :  { %v1732_v63 = vadd.f32 %v2856_v59, %v1731_v62  ;;  %v1733_v7 = vpop.f32.mrb[97].mxu1 }
 0x2f6   :  { %v1734_v12 = vpop.f32.mrb[98].mxu1 }
 0x2f7   :  { %1830 = vst [vmem:[#allocation8 + $0x1a0] sm:$0xff] %v1732_v63  ;;  %v1735_v16 = vadd.f32 %v2856_v59, %v1734_v12  ;;  %v1736_v1 = vpop.f32.mrb[99].mxu1 }
 0x2f9   :  { %1831 = vst [vmem:[#allocation8 + $0x1a8] sm:$0xff] %v1735_v16 }
 0x2fc   :  { %v1739_v15 = vpop.f32.mrb[100].mxu1 }
 0x2fd   :  { %v1740_v6 = vadd.f32 %v2856_v59, %v1739_v15  ;;  %v1741_v9 = vpop.f32.mrb[101].mxu1 }
 0x2fe   :  { %v1742_v11 = vpop.f32.mrb[102].mxu1 }
 0x2ff   :  { %1832 = vst [vmem:[#allocation8 + $0x1b0] sm:$0xff] %v1740_v6  ;;  %v1743_v48 = vadd.f32 %v2856_v59, %v1742_v11  ;;  %v1744_v20 = vpop.f32.mrb[103].mxu1 }
 0x301   :  { %1833 = vst [vmem:[#allocation8 + $0x1b8] sm:$0xff] %v1743_v48 }
 0x304   :  { %v1747_v21 = vpop.f32.mrb[104].mxu1 }
 0x305   :  { %v1748_v10 = vadd.f32 %v2856_v59, %v1747_v21  ;;  %v1749_v17 = vpop.f32.mrb[105].mxu1 }
 0x306   :  { %v1750_v18 = vpop.f32.mrb[106].mxu1 }
 0x307   :  { %1834 = vst [vmem:[#allocation8 + $0x1c0] sm:$0xff] %v1748_v10  ;;  %v1751_v43 = vadd.f32 %v2856_v59, %v1750_v18  ;;  %v1752_v31 = vpop.f32.mrb[107].mxu1 }
 0x309   :  { %1835 = vst [vmem:[#allocation8 + $0x1c8] sm:$0xff] %v1751_v43 }
 0x30c   :  { %v1755_v26 = vpop.f32.mrb[108].mxu1 }
 0x30d   :  { %v1756_v27 = vadd.f32 %v2856_v59, %v1755_v26  ;;  %v1757_v19 = vpop.f32.mrb[109].mxu1 }
 0x30e   :  { %v1758_v23 = vpop.f32.mrb[110].mxu1 }
 0x30f   :  { %1836 = vst [vmem:[#allocation8 + $0x1d0] sm:$0xff] %v1756_v27  ;;  %v1759_v24 = vadd.f32 %v2856_v59, %v1758_v23  ;;  %v1760_v28 = vpop.f32.mrb[111].mxu1 }
 0x311   :  { %1837 = vst [vmem:[#allocation8 + $0x1d8] sm:$0xff] %v1759_v24 }
 0x314   :  { %v1763_v33 = vpop.f32.mrb[112].mxu1 }
 0x315   :  { %v1764_v34 = vadd.f32 %v2856_v59, %v1763_v33  ;;  %v1765_v35 = vpop.f32.mrb[113].mxu1 }
 0x316   :  { %v1766_v25 = vpop.f32.mrb[114].mxu1 }
 0x317   :  { %1838 = vst [vmem:[#allocation8 + $0x1e0] sm:$0xff] %v1764_v34  ;;  %v1767_v0 = vadd.f32 %v2856_v59, %v1766_v25  ;;  %v1768_v29 = vpop.f32.mrb[115].mxu1 }
 0x319   :  { %1839 = vst [vmem:[#allocation8 + $0x1e8] sm:$0xff] %v1767_v0 }
 0x31c   :  { %v1771_v39 = vpop.f32.mrb[116].mxu1 }
 0x31d   :  { %v1772_v40 = vadd.f32 %v2856_v59, %v1771_v39  ;;  %v1773_v52 = vpop.f32.mrb[117].mxu1 }
 0x31e   :  { %v1774_v32 = vpop.f32.mrb[118].mxu1 }
 0x31f   :  { %1840 = vst [vmem:[#allocation8 + $0x1f0] sm:$0xff] %v1772_v40  ;;  %v1775_v36 = vadd.f32 %v2856_v59, %v1774_v32  ;;  %v1776_v37 = vpop.f32.mrb[119].mxu1 }
 0x321   :  { %1841 = vst [vmem:[#allocation8 + $0x1f8] sm:$0xff] %v1775_v36 }
 0x322   :  { %2181 = shalt.err (!%p2178_p0)
}
 0x323   :  { %s2182_s14 = scalar_lea.hbm %s2959_s5, 8192 }
 0x324   :  { %p2183_p1 = scmp.ne.s32.totalorder %s2959_s5, %s2182_s14  ;;  %p2186_p2 = scmp.lt.u32.totalorder %s2182_s14, %s2959_s5 }
 0x326   :  { %p2188_p3 = pnand %p2186_p2, %p2183_p1 }
 0x328   :  { %2191 = shalt.err (!%p2188_p3)
}
 0x329   :  { %1853 = dma.vmem_to_hbm [thread:$0]  %s1848_s10, 8192, %s2959_s5, [#allocation4], %s2200_s30, %s2200_s30, %s2201_s6  }
 0x32a   :  { %2196 = dma.done.wait [#allocation4], 8192  }
 0x32b   :  { %2197 = vsyncadd [#allocation4], 4294959104 }
 0x32c   :  { %1857 = vsyncpa [#allocation3], 1 }
 0x32d   :  { %1858 = vsyncpa [#allocation6], 1 }
 0x32e   :  { %1859 = vsyncpa [#allocation4], 1 }

</bundles_post_ra>
